<compile_context>
chip_gen: v5e
topology: v5e:2x2
jax: 0.10.0
libtpu: 0.0.40
codegen_flags: <defaults>
</compile_context>

<pallas_src>
from functools import partial

import numpy as np
import jax
import jax.numpy as jnp
from jax.experimental import pallas as pl
from jax.experimental.pallas import tpu as pltpu

# ----------------------- module configuration (small, deterministic) --------
DIM_IN   = 4
DIM_OUT  = 4          # dim_out=None -> dim_in in the module; keep 4
HEADS    = 2
DIM_HEAD = 16
INNER    = HEADS * DIM_HEAD            # 32
KSIZE    = 3                           # conv_args['kernel_size']
PAD      = 1                           # conv_args['padding']
STRIDE   = 1                           # conv_args['stride']
DILATION = 1                           # conv_args['dilation']
K_DOWN   = 1                           # `k` arg of the module (to_kv 1x1/stride-1 conv)
WIN      = KSIZE * KSIZE               # 9
SCALE    = DIM_HEAD ** (-0.5)


# --------------------------- fused Pallas kernel -----------------------------
def _conv_attn2d_kernel(x_ref, wqkv_ref, wo_ref, bo_ref, hsum_ref, hsumt_ref,
                        mask_ref, y_ref, attn_ref, slab_ref, *, inner, win, n, shifts):
    """One batch element per grid step; all intermediates stay in VMEM/vregs."""
    x = x_ref[0]                                            # (C, N), N on lanes

    # --- to_q / to_kv 1x1 convs fused into ONE channel matmul on the MXU ---
    proj = jnp.dot(wqkv_ref[...], x, preferred_element_type=jnp.float32)   # (3*INNER, N)
    q = proj[:inner, :]                                     # 8-aligned sublane slices (free)
    k = proj[inner:2 * inner, :]
    v = proj[2 * inner:, :]

    # --- pass 1: stage q * roll(k) for every 3x3 tap into the lane-concatenated
    #     slab.  Window (kh,kw) == lane-roll of the flattened spatial axis by
    #     dy*W+dx; out-of-image taps are zeroed later by the mask (== F.unfold
    #     zero padding).  Stores are dense and 128-lane aligned (offsets w*N).
    for w in range(win):
        s = shifts[w]
        k_r = pltpu.roll(k, shift=s, axis=1) if s else k    # (INNER, N), XLU slot
        slab_ref[:, w * n:(w + 1) * n] = q * k_r

    # --- all WIN*HEADS dots in ONE MXU matmul; SCALE is folded into hsum entries ---
    dots = jnp.dot(hsum_ref[...], slab_ref[...],
                   preferred_element_type=jnp.float32)      # (HEADS, WIN*N)
    dots = dots * mask_ref[...]                             # zero padded taps (one slab mult)

    # --- streaming softmax over the 9 window blocks (aligned lane slices) ---
    m = dots[:, :n]
    for w in range(1, win):
        m = jnp.maximum(m, dots[:, w * n:(w + 1) * n])      # running max, (HEADS, N)
    e = [jnp.exp(dots[:, w * n:(w + 1) * n] - m) for w in range(win)]
    den = e[0]
    for w in range(1, win):
        den = den + e[w]
    inv = pl.reciprocal(den, approx=True)                   # EUP slot; frees the VALU

    # normalized probabilities for ALL windows, lane-concatenated; ONE dense store.
    probs = jnp.concatenate([e_w * inv for e_w in e], axis=1)   # (HEADS, WIN*N)
    attn_ref[0] = probs

    # --- pass 2: broadcast each head's weight to its dim_head rows with ONE
    #     matmul (block-diag ones^T); border mask folded into the weights so the
    #     wrapped-around rolled v contributes exactly 0 (matches F.unfold zeros).
    #     The slab scratch is dead after the dots matmul -> reuse it.
    slab_ref[...] = jnp.dot(hsumt_ref[...], probs * mask_ref[...],
                            preferred_element_type=jnp.float32)  # (INNER, WIN*N)
    acc = jnp.zeros((inner, n), dtype=jnp.float32)
    for w in range(win):
        s = shifts[w]
        v_r = pltpu.roll(v, shift=s, axis=1) if s else v
        acc = acc + slab_ref[:, w * n:(w + 1) * n] * v_r

    # --- to_out 1x1 conv + bias: lane-dense (dim_out, N) output (NCHW-flat) ---
    y = jnp.dot(wo_ref[...], acc, preferred_element_type=jnp.float32) + bo_ref[...]
    y_ref[0] = y.astype(y_ref.dtype)


# --------------------------------- wrapper -----------------------------------
def _window_geometry(H, W, ksize, pad, dilation):
    """Border masks + lane-roll shifts for every (kh, kw) tap, in F.unfold order."""
    N = H * W
    ii, jj = np.meshgrid(np.arange(H), np.arange(W), indexing="ij")
    masks, shifts = [], []
    for kh in range(ksize):
        for kw in range(ksize):
            dy = kh * dilation - pad
            dx = kw * dilation - pad
            valid = ((ii + dy >= 0) & (ii + dy < H) &
                     (jj + dx >= 0) & (jj + dx < W))
            masks.append(valid.reshape(N).astype(np.float32))
            shifts.append(int((-(dy * W + dx)) % N))
    return np.stack(masks, axis=0), tuple(shifts)


def conv_attention2d_forward(x_nchw, params):
    b, c, H, W = x_nchw.shape
    n = H * W
    # TODO(synk): only the instantiated config (kernel_size=3, padding=1, stride=1,
    #             dilation=1, k=1) is implemented; Dropout(p=0.0) is identity and the
    #             optional additive `mask` argument (mask=None path) is not supported.
    x = x_nchw.reshape(b, c, n)                                   # NCHW -> (B, C, N), free

    mask_np, shifts = _window_geometry(H, W, KSIZE, PAD, DILATION)
    mask_row = jnp.asarray(mask_np.reshape(1, WIN * n))           # (1, WIN*N) lane-concat
    hsum_np = np.repeat(np.eye(HEADS, dtype=np.float32), DIM_HEAD, axis=1)   # (HEADS, INNER)
    hsum_scaled = jnp.asarray(hsum_np * SCALE)                    # SCALE folded into ones
    hsum_t = jnp.asarray(np.ascontiguousarray(hsum_np.T))         # (INNER, HEADS), unscaled
    # Fused projection weight: one (3*INNER, C) matmul instead of to_q + to_kv.
    w_qkv = jnp.concatenate([params["w_q"], params["w_kv"]], axis=0)         # (96, C)
    bo = params["b_o"].reshape(DIM_OUT, 1)

    kernel = partial(_conv_attn2d_kernel, inner=INNER, win=WIN, n=n, shifts=shifts)

    y, attn = pl.pallas_call(
        kernel,
        out_shape=(
            jax.ShapeDtypeStruct((b, DIM_OUT, n), jnp.float32),       # NCHW-flat, lane-dense
            jax.ShapeDtypeStruct((b, HEADS, WIN * n), jnp.float32),   # lane-dense attention
        ),
        grid=(b,),
        in_specs=[
            pl.BlockSpec((1, c, n), lambda i: (i, 0, 0)),             # x
            pl.BlockSpec((3 * INNER, c), lambda i: (0, 0)),           # fused w_qkv
            pl.BlockSpec((DIM_OUT, INNER), lambda i: (0, 0)),         # w_o
            pl.BlockSpec((DIM_OUT, 1), lambda i: (0, 0)),             # b_o
            pl.BlockSpec((HEADS, INNER), lambda i: (0, 0)),           # scaled block-diag ones
            pl.BlockSpec((INNER, HEADS), lambda i: (0, 0)),           # its (unscaled) transpose
            pl.BlockSpec((1, WIN * n), lambda i: (0, 0)),             # border mask, lane-concat
        ],
        out_specs=(
            pl.BlockSpec((1, DIM_OUT, n), lambda i: (i, 0, 0)),
            pl.BlockSpec((1, HEADS, WIN * n), lambda i: (i, 0, 0)),
        ),
        scratch_shapes=[pltpu.VMEM((INNER, WIN * n), jnp.float32)],   # ~288 KB, reused twice
        compiler_params=pltpu.CompilerParams(
            dimension_semantics=("parallel",),     # grid=(B,)=(2,): keeps both v7x TCs busy
        ),
    )(x, w_qkv, params["w_o"], bo, hsum_scaled, hsum_t, mask_row)

    y = y.reshape(b, DIM_OUT, H, W)                                  # already NCHW
    attn = attn.reshape(b, HEADS, WIN, n).transpose(0, 1, 3, 2)      # (B, heads, N, win), ~37 KB
    return y, attn


# ---------------------------- pure-JAX reference -----------------------------
def reference_forward(x_nchw, params):
    b, c, H, W = x_nchw.shape
    N = H * W
    xf = x_nchw.transpose(0, 2, 3, 1)                                  # (b,H,W,C)
    qf = jnp.einsum("bhwc,oc->bhwo", xf, params["w_q"])
    kvf = jnp.einsum("bhwc,oc->bhwo", xf, params["w_kv"])
    kf, vf = kvf[..., :INNER], kvf[..., INNER:]

    def unfold(t):
        tp = jnp.pad(t, ((0, 0), (PAD, PAD), (PAD, PAD), (0, 0)))
        pats = [tp[:, kh:kh + H, kw:kw + W, :]
                for kh in range(KSIZE) for kw in range(KSIZE)]
        return jnp.stack(pats, axis=3).reshape(b, N, WIN, HEADS, DIM_HEAD)

    k_u, v_u = unfold(kf), unfold(vf)                                  # (b,N,win,h,dh)
    qh = qf.reshape(b, N, HEADS, DIM_HEAD)
    dots = jnp.einsum("bnhd,bnwhd->bhnw", qh, k_u) * SCALE
    attn = jax.nn.softmax(dots, axis=-1)
    out = jnp.einsum("bhnw,bnwhd->bhnd", attn, v_u)                    # (b,h,N,dh)
    out = out.transpose(0, 2, 1, 3).reshape(b, N, INNER)
    y = jnp.einsum("bni,oi->bno", out, params["w_o"]) + params["b_o"]
    y = y.reshape(b, H, W, DIM_OUT).transpose(0, 3, 1, 2)
    return y, attn


# ------------------------------------ main -----------------------------------
if __name__ == "__main__":
    key = jax.random.PRNGKey(0)
    k1, k2, k3, k4, kx = jax.random.split(key, 5)
    params = {
        "w_q":  0.1 * jax.random.normal(k1, (INNER, DIM_IN), jnp.float32),      # Conv2d(inner, C, 1)
        "w_kv": 0.1 * jax.random.normal(k2, (2 * INNER, DIM_IN), jnp.float32),  # Conv2d(2*inner, C, 1)
        "w_o":  0.1 * jax.random.normal(k3, (DIM_OUT, INNER), jnp.float32),     # Conv2d(dim_out, inner, 1)
        "b_o":  0.1 * jax.random.normal(k4, (DIM_OUT,), jnp.float32),
    }
    x = jax.random.normal(kx, (2, DIM_IN, 16, 16), jnp.float32)                 # NCHW

    fwd = jax.jit(conv_attention2d_forward)
    y, attn = fwd(x, params)
    jax.block_until_ready((y, attn))

    y_exp, attn_exp = reference_forward(x, params)
    assert y.shape == (2, DIM_OUT, 16, 16) and attn.shape == (2, HEADS, 256, WIN)
    assert jnp.allclose(y, y_exp, atol=1e-2, rtol=1e-2), \
        float(jnp.max(jnp.abs(y - y_exp)))
    assert jnp.allclose(attn, attn_exp, atol=1e-2, rtol=1e-2), \
        float(jnp.max(jnp.abs(attn - attn_exp)))

    print("KERNEL_OK")
</pallas_src>

<mosaic_0001>
module attributes {stable_mosaic.version = 11 : i64} {
  func.func @_conv_attn2d_kernel(%arg0: i32, %arg1: memref<1x4x256xf32, #tpu.memory_space<vmem>>, %arg2: memref<96x4xf32, #tpu.memory_space<vmem>>, %arg3: memref<4x32xf32, #tpu.memory_space<vmem>>, %arg4: memref<4x1xf32, #tpu.memory_space<vmem>>, %arg5: memref<2x32xf32, #tpu.memory_space<vmem>>, %arg6: memref<32x2xf32, #tpu.memory_space<vmem>>, %arg7: memref<1x2304xf32, #tpu.memory_space<vmem>>, %arg8: memref<1x4x256xf32, #tpu.memory_space<vmem>>, %arg9: memref<1x2x2304xf32, #tpu.memory_space<vmem>>, %arg10: memref<32x2304xf32, #tpu.memory_space<vmem>>) attributes {dimension_semantics = [#tpu.dimension_semantics<parallel>], iteration_bounds = array<i64: 2>, scalar_prefetch = 0 : i64, scratch_operands = 1 : i64, tpu.core_type = #tpu.core_type<tc>, window_params = [{transform_indices = @transform_0, window_bounds = array<i64: 1, 4, 256>}, {pipeline_mode = #tpu.pipeline_mode<synchronous>, transform_indices = @transform_1, window_bounds = array<i64: 96, 4>}, {pipeline_mode = #tpu.pipeline_mode<synchronous>, transform_indices = @transform_2, window_bounds = array<i64: 4, 32>}, {pipeline_mode = #tpu.pipeline_mode<synchronous>, transform_indices = @transform_3, window_bounds = array<i64: 4, 1>}, {pipeline_mode = #tpu.pipeline_mode<synchronous>, transform_indices = @transform_4, window_bounds = array<i64: 2, 32>}, {pipeline_mode = #tpu.pipeline_mode<synchronous>, transform_indices = @transform_5, window_bounds = array<i64: 32, 2>}, {pipeline_mode = #tpu.pipeline_mode<synchronous>, transform_indices = @transform_6, window_bounds = array<i64: 1, 2304>}, {transform_indices = @transform_7, window_bounds = array<i64: 1, 4, 256>}, {transform_indices = @transform_8, window_bounds = array<i64: 1, 2, 2304>}]} {
    %c0 = arith.constant 0 : index
    %c0_0 = arith.constant 0 : index
    %c0_1 = arith.constant 0 : index
    %0 = vector.load %arg1[%c0, %c0_0, %c0_1] : memref<1x4x256xf32, #tpu.memory_space<vmem>>, vector<1x4x256xf32>
    %1 = vector.shape_cast %0 : vector<1x4x256xf32> to vector<4x256xf32>
    %c0_2 = arith.constant 0 : index
    %c0_3 = arith.constant 0 : index
    %2 = vector.load %arg2[%c0_2, %c0_3] : memref<96x4xf32, #tpu.memory_space<vmem>>, vector<96x4xf32>
    %cst = arith.constant dense<0.000000e+00> : vector<96x256xf32>
    %3 = tpu.matmul %2, %1, %cst {dimension_numbers = #tpu.dot_dimension_numbers<[1], [0], [0], [1], [0, 0, 1, 1], [], []>} : vector<96x4xf32>, vector<4x256xf32>, vector<96x256xf32> -> vector<96x256xf32>
    %4 = vector.extract_strided_slice %3 {offsets = [0, 0], sizes = [32, 256], strides = [1, 1]} : vector<96x256xf32> to vector<32x256xf32>
    %5 = vector.extract_strided_slice %3 {offsets = [32, 0], sizes = [32, 256], strides = [1, 1]} : vector<96x256xf32> to vector<32x256xf32>
    %6 = vector.extract_strided_slice %3 {offsets = [64, 0], sizes = [32, 256], strides = [1, 1]} : vector<96x256xf32> to vector<32x256xf32>
    %c17_i32 = arith.constant 17 : i32
    %7 = tpu.dynamic_rotate %5 by %c17_i32 dim 1 : vector<32x256xf32>, i32 -> vector<32x256xf32>
    %8 = arith.mulf %4, %7 : vector<32x256xf32>
    %c0_4 = arith.constant 0 : index
    %c0_5 = arith.constant 0 : index
    %9 = vector.load %arg10[%c0_4, %c0_5] : memref<32x2304xf32, #tpu.memory_space<vmem>>, vector<32x256xf32>
    tpu.vector_store %arg10[%c0_4, %c0_5], %8 {strides = array<i32>} : memref<32x2304xf32, #tpu.memory_space<vmem>>, vector<32x256xf32>,
    %c16_i32 = arith.constant 16 : i32
    %10 = tpu.dynamic_rotate %5 by %c16_i32 dim 1 : vector<32x256xf32>, i32 -> vector<32x256xf32>
    %11 = arith.mulf %4, %10 : vector<32x256xf32>
    %c0_6 = arith.constant 0 : index
    %c256 = arith.constant 256 : index
    %12 = vector.load %arg10[%c0_6, %c256] : memref<32x2304xf32, #tpu.memory_space<vmem>>, vector<32x256xf32>
    tpu.vector_store %arg10[%c0_6, %c256], %11 {strides = array<i32>} : memref<32x2304xf32, #tpu.memory_space<vmem>>, vector<32x256xf32>,
    %c15_i32 = arith.constant 15 : i32
    %13 = tpu.dynamic_rotate %5 by %c15_i32 dim 1 : vector<32x256xf32>, i32 -> vector<32x256xf32>
    %14 = arith.mulf %4, %13 : vector<32x256xf32>
    %c0_7 = arith.constant 0 : index
    %c512 = arith.constant 512 : index
    %15 = vector.load %arg10[%c0_7, %c512] : memref<32x2304xf32, #tpu.memory_space<vmem>>, vector<32x256xf32>
    tpu.vector_store %arg10[%c0_7, %c512], %14 {strides = array<i32>} : memref<32x2304xf32, #tpu.memory_space<vmem>>, vector<32x256xf32>,
    %c1_i32 = arith.constant 1 : i32
    %16 = tpu.dynamic_rotate %5 by %c1_i32 dim 1 : vector<32x256xf32>, i32 -> vector<32x256xf32>
    %17 = arith.mulf %4, %16 : vector<32x256xf32>
    %c0_8 = arith.constant 0 : index
    %c768 = arith.constant 768 : index
    %18 = vector.load %arg10[%c0_8, %c768] : memref<32x2304xf32, #tpu.memory_space<vmem>>, vector<32x256xf32>
    tpu.vector_store %arg10[%c0_8, %c768], %17 {strides = array<i32>} : memref<32x2304xf32, #tpu.memory_space<vmem>>, vector<32x256xf32>,
    %19 = arith.mulf %4, %5 : vector<32x256xf32>
    %c0_9 = arith.constant 0 : index
    %c1024 = arith.constant 1024 : index
    %20 = vector.load %arg10[%c0_9, %c1024] : memref<32x2304xf32, #tpu.memory_space<vmem>>, vector<32x256xf32>
    tpu.vector_store %arg10[%c0_9, %c1024], %19 {strides = array<i32>} : memref<32x2304xf32, #tpu.memory_space<vmem>>, vector<32x256xf32>,
    %c255_i32 = arith.constant 255 : i32
    %21 = tpu.dynamic_rotate %5 by %c255_i32 dim 1 : vector<32x256xf32>, i32 -> vector<32x256xf32>
    %22 = arith.mulf %4, %21 : vector<32x256xf32>
    %c0_10 = arith.constant 0 : index
    %c1280 = arith.constant 1280 : index
    %23 = vector.load %arg10[%c0_10, %c1280] : memref<32x2304xf32, #tpu.memory_space<vmem>>, vector<32x256xf32>
    tpu.vector_store %arg10[%c0_10, %c1280], %22 {strides = array<i32>} : memref<32x2304xf32, #tpu.memory_space<vmem>>, vector<32x256xf32>,
    %c241_i32 = arith.constant 241 : i32
    %24 = tpu.dynamic_rotate %5 by %c241_i32 dim 1 : vector<32x256xf32>, i32 -> vector<32x256xf32>
    %25 = arith.mulf %4, %24 : vector<32x256xf32>
    %c0_11 = arith.constant 0 : index
    %c1536 = arith.constant 1536 : index
    %26 = vector.load %arg10[%c0_11, %c1536] : memref<32x2304xf32, #tpu.memory_space<vmem>>, vector<32x256xf32>
    tpu.vector_store %arg10[%c0_11, %c1536], %25 {strides = array<i32>} : memref<32x2304xf32, #tpu.memory_space<vmem>>, vector<32x256xf32>,
    %c240_i32 = arith.constant 240 : i32
    %27 = tpu.dynamic_rotate %5 by %c240_i32 dim 1 : vector<32x256xf32>, i32 -> vector<32x256xf32>
    %28 = arith.mulf %4, %27 : vector<32x256xf32>
    %c0_12 = arith.constant 0 : index
    %c1792 = arith.constant 1792 : index
    %29 = vector.load %arg10[%c0_12, %c1792] : memref<32x2304xf32, #tpu.memory_space<vmem>>, vector<32x256xf32>
    tpu.vector_store %arg10[%c0_12, %c1792], %28 {strides = array<i32>} : memref<32x2304xf32, #tpu.memory_space<vmem>>, vector<32x256xf32>,
    %c239_i32 = arith.constant 239 : i32
    %30 = tpu.dynamic_rotate %5 by %c239_i32 dim 1 : vector<32x256xf32>, i32 -> vector<32x256xf32>
    %31 = arith.mulf %4, %30 : vector<32x256xf32>
    %c0_13 = arith.constant 0 : index
    %c2048 = arith.constant 2048 : index
    %32 = vector.load %arg10[%c0_13, %c2048] : memref<32x2304xf32, #tpu.memory_space<vmem>>, vector<32x256xf32>
    tpu.vector_store %arg10[%c0_13, %c2048], %31 {strides = array<i32>} : memref<32x2304xf32, #tpu.memory_space<vmem>>, vector<32x256xf32>,
    %c0_14 = arith.constant 0 : index
    %c0_15 = arith.constant 0 : index
    %33 = vector.load %arg5[%c0_14, %c0_15] : memref<2x32xf32, #tpu.memory_space<vmem>>, vector<2x32xf32>
    %c0_16 = arith.constant 0 : index
    %c0_17 = arith.constant 0 : index
    %34 = vector.load %arg10[%c0_16, %c0_17] : memref<32x2304xf32, #tpu.memory_space<vmem>>, vector<32x2304xf32>
    %cst_18 = arith.constant dense<0.000000e+00> : vector<2x2304xf32>
    %35 = tpu.matmul %33, %34, %cst_18 {dimension_numbers = #tpu.dot_dimension_numbers<[1], [0], [0], [1], [0, 0, 1, 1], [], []>} : vector<2x32xf32>, vector<32x2304xf32>, vector<2x2304xf32> -> vector<2x2304xf32>
    %c0_19 = arith.constant 0 : index
    %c0_20 = arith.constant 0 : index
    %36 = vector.load %arg7[%c0_19, %c0_20] : memref<1x2304xf32, #tpu.memory_space<vmem>>, vector<1x2304xf32>
    %37 = vector.broadcast %36 : vector<1x2304xf32> to vector<2x2304xf32>
    %38 = arith.mulf %35, %37 : vector<2x2304xf32>
    %39 = vector.extract_strided_slice %38 {offsets = [0, 0], sizes = [2, 256], strides = [1, 1]} : vector<2x2304xf32> to vector<2x256xf32>
    %40 = vector.extract_strided_slice %38 {offsets = [0, 256], sizes = [2, 256], strides = [1, 1]} : vector<2x2304xf32> to vector<2x256xf32>
    %41 = arith.maximumf %39, %40 : vector<2x256xf32>
    %42 = vector.extract_strided_slice %38 {offsets = [0, 512], sizes = [2, 256], strides = [1, 1]} : vector<2x2304xf32> to vector<2x256xf32>
    %43 = arith.maximumf %41, %42 : vector<2x256xf32>
    %44 = vector.extract_strided_slice %38 {offsets = [0, 768], sizes = [2, 256], strides = [1, 1]} : vector<2x2304xf32> to vector<2x256xf32>
    %45 = arith.maximumf %43, %44 : vector<2x256xf32>
    %46 = vector.extract_strided_slice %38 {offsets = [0, 1024], sizes = [2, 256], strides = [1, 1]} : vector<2x2304xf32> to vector<2x256xf32>
    %47 = arith.maximumf %45, %46 : vector<2x256xf32>
    %48 = vector.extract_strided_slice %38 {offsets = [0, 1280], sizes = [2, 256], strides = [1, 1]} : vector<2x2304xf32> to vector<2x256xf32>
    %49 = arith.maximumf %47, %48 : vector<2x256xf32>
    %50 = vector.extract_strided_slice %38 {offsets = [0, 1536], sizes = [2, 256], strides = [1, 1]} : vector<2x2304xf32> to vector<2x256xf32>
    %51 = arith.maximumf %49, %50 : vector<2x256xf32>
    %52 = vector.extract_strided_slice %38 {offsets = [0, 1792], sizes = [2, 256], strides = [1, 1]} : vector<2x2304xf32> to vector<2x256xf32>
    %53 = arith.maximumf %51, %52 : vector<2x256xf32>
    %54 = vector.extract_strided_slice %38 {offsets = [0, 2048], sizes = [2, 256], strides = [1, 1]} : vector<2x2304xf32> to vector<2x256xf32>
    %55 = arith.maximumf %53, %54 : vector<2x256xf32>
    %56 = vector.extract_strided_slice %38 {offsets = [0, 0], sizes = [2, 256], strides = [1, 1]} : vector<2x2304xf32> to vector<2x256xf32>
    %57 = arith.subf %56, %55 : vector<2x256xf32>
    %58 = math.exp %57 : vector<2x256xf32>
    %59 = vector.extract_strided_slice %38 {offsets = [0, 256], sizes = [2, 256], strides = [1, 1]} : vector<2x2304xf32> to vector<2x256xf32>
    %60 = arith.subf %59, %55 : vector<2x256xf32>
    %61 = math.exp %60 : vector<2x256xf32>
    %62 = vector.extract_strided_slice %38 {offsets = [0, 512], sizes = [2, 256], strides = [1, 1]} : vector<2x2304xf32> to vector<2x256xf32>
    %63 = arith.subf %62, %55 : vector<2x256xf32>
    %64 = math.exp %63 : vector<2x256xf32>
    %65 = vector.extract_strided_slice %38 {offsets = [0, 768], sizes = [2, 256], strides = [1, 1]} : vector<2x2304xf32> to vector<2x256xf32>
    %66 = arith.subf %65, %55 : vector<2x256xf32>
    %67 = math.exp %66 : vector<2x256xf32>
    %68 = vector.extract_strided_slice %38 {offsets = [0, 1024], sizes = [2, 256], strides = [1, 1]} : vector<2x2304xf32> to vector<2x256xf32>
    %69 = arith.subf %68, %55 : vector<2x256xf32>
    %70 = math.exp %69 : vector<2x256xf32>
    %71 = vector.extract_strided_slice %38 {offsets = [0, 1280], sizes = [2, 256], strides = [1, 1]} : vector<2x2304xf32> to vector<2x256xf32>
    %72 = arith.subf %71, %55 : vector<2x256xf32>
    %73 = math.exp %72 : vector<2x256xf32>
    %74 = vector.extract_strided_slice %38 {offsets = [0, 1536], sizes = [2, 256], strides = [1, 1]} : vector<2x2304xf32> to vector<2x256xf32>
    %75 = arith.subf %74, %55 : vector<2x256xf32>
    %76 = math.exp %75 : vector<2x256xf32>
    %77 = vector.extract_strided_slice %38 {offsets = [0, 1792], sizes = [2, 256], strides = [1, 1]} : vector<2x2304xf32> to vector<2x256xf32>
    %78 = arith.subf %77, %55 : vector<2x256xf32>
    %79 = math.exp %78 : vector<2x256xf32>
    %80 = vector.extract_strided_slice %38 {offsets = [0, 2048], sizes = [2, 256], strides = [1, 1]} : vector<2x2304xf32> to vector<2x256xf32>
    %81 = arith.subf %80, %55 : vector<2x256xf32>
    %82 = math.exp %81 : vector<2x256xf32>
    %83 = arith.addf %58, %61 : vector<2x256xf32>
    %84 = arith.addf %83, %64 : vector<2x256xf32>
    %85 = arith.addf %84, %67 : vector<2x256xf32>
    %86 = arith.addf %85, %70 : vector<2x256xf32>
    %87 = arith.addf %86, %73 : vector<2x256xf32>
    %88 = arith.addf %87, %76 : vector<2x256xf32>
    %89 = arith.addf %88, %79 : vector<2x256xf32>
    %90 = arith.addf %89, %82 : vector<2x256xf32>
    %91 = tpu.reciprocal %90 {approx = true} : vector<2x256xf32> -> vector<2x256xf32>
    %92 = arith.mulf %58, %91 : vector<2x256xf32>
    %93 = arith.mulf %61, %91 : vector<2x256xf32>
    %94 = arith.mulf %64, %91 : vector<2x256xf32>
    %95 = arith.mulf %67, %91 : vector<2x256xf32>
    %96 = arith.mulf %70, %91 : vector<2x256xf32>
    %97 = arith.mulf %73, %91 : vector<2x256xf32>
    %98 = arith.mulf %76, %91 : vector<2x256xf32>
    %99 = arith.mulf %79, %91 : vector<2x256xf32>
    %100 = arith.mulf %82, %91 : vector<2x256xf32>
    %101 = tpu.concatenate %92, %93, %94, %95, %96, %97, %98, %99, %100 in 1 : vector<2x256xf32>, vector<2x256xf32>, vector<2x256xf32>, vector<2x256xf32>, vector<2x256xf32>, vector<2x256xf32>, vector<2x256xf32>, vector<2x256xf32>, vector<2x256xf32> -> vector<2x2304xf32>
    %c0_21 = arith.constant 0 : index
    %c0_22 = arith.constant 0 : index
    %c0_23 = arith.constant 0 : index
    %102 = vector.load %arg9[%c0_21, %c0_22, %c0_23] : memref<1x2x2304xf32, #tpu.memory_space<vmem>>, vector<1x2x2304xf32>
    %103 = vector.shape_cast %102 : vector<1x2x2304xf32> to vector<2x2304xf32>
    %104 = vector.shape_cast %101 : vector<2x2304xf32> to vector<1x2x2304xf32>
    tpu.vector_store %arg9[%c0_21, %c0_22, %c0_23], %104 {strides = array<i32>} : memref<1x2x2304xf32, #tpu.memory_space<vmem>>, vector<1x2x2304xf32>,
    %c0_24 = arith.constant 0 : index
    %c0_25 = arith.constant 0 : index
    %105 = vector.load %arg6[%c0_24, %c0_25] : memref<32x2xf32, #tpu.memory_space<vmem>>, vector<32x2xf32>
    %c0_26 = arith.constant 0 : index
    %c0_27 = arith.constant 0 : index
    %106 = vector.load %arg7[%c0_26, %c0_27] : memref<1x2304xf32, #tpu.memory_space<vmem>>, vector<1x2304xf32>
    %107 = vector.broadcast %106 : vector<1x2304xf32> to vector<2x2304xf32>
    %108 = arith.mulf %101, %107 : vector<2x2304xf32>
    %cst_28 = arith.constant dense<0.000000e+00> : vector<32x2304xf32>
    %109 = tpu.matmul %105, %108, %cst_28 {dimension_numbers = #tpu.dot_dimension_numbers<[1], [0], [0], [1], [0, 0, 1, 1], [], []>} : vector<32x2xf32>, vector<2x2304xf32>, vector<32x2304xf32> -> vector<32x2304xf32>
    %c0_29 = arith.constant 0 : index
    %c0_30 = arith.constant 0 : index
    %110 = vector.load %arg10[%c0_29, %c0_30] : memref<32x2304xf32, #tpu.memory_space<vmem>>, vector<32x2304xf32>
    tpu.vector_store %arg10[%c0_29, %c0_30], %109 {strides = array<i32>} : memref<32x2304xf32, #tpu.memory_space<vmem>>, vector<32x2304xf32>,
    %cst_31 = arith.constant 0.000000e+00 : f32
    %111 = vector.broadcast %cst_31 : f32 to vector<32x256xf32>
    %c17_i32_32 = arith.constant 17 : i32
    %112 = tpu.dynamic_rotate %6 by %c17_i32_32 dim 1 : vector<32x256xf32>, i32 -> vector<32x256xf32>
    %c0_33 = arith.constant 0 : index
    %c0_34 = arith.constant 0 : index
    %113 = vector.load %arg10[%c0_33, %c0_34] : memref<32x2304xf32, #tpu.memory_space<vmem>>, vector<32x256xf32>
    %114 = arith.mulf %113, %112 : vector<32x256xf32>
    %115 = arith.addf %111, %114 : vector<32x256xf32>
    %c16_i32_35 = arith.constant 16 : i32
    %116 = tpu.dynamic_rotate %6 by %c16_i32_35 dim 1 : vector<32x256xf32>, i32 -> vector<32x256xf32>
    %c0_36 = arith.constant 0 : index
    %c256_37 = arith.constant 256 : index
    %117 = vector.load %arg10[%c0_36, %c256_37] : memref<32x2304xf32, #tpu.memory_space<vmem>>, vector<32x256xf32>
    %118 = arith.mulf %117, %116 : vector<32x256xf32>
    %119 = arith.addf %115, %118 : vector<32x256xf32>
    %c15_i32_38 = arith.constant 15 : i32
    %120 = tpu.dynamic_rotate %6 by %c15_i32_38 dim 1 : vector<32x256xf32>, i32 -> vector<32x256xf32>
    %c0_39 = arith.constant 0 : index
    %c512_40 = arith.constant 512 : index
    %121 = vector.load %arg10[%c0_39, %c512_40] : memref<32x2304xf32, #tpu.memory_space<vmem>>, vector<32x256xf32>
    %122 = arith.mulf %121, %120 : vector<32x256xf32>
    %123 = arith.addf %119, %122 : vector<32x256xf32>
    %c1_i32_41 = arith.constant 1 : i32
    %124 = tpu.dynamic_rotate %6 by %c1_i32_41 dim 1 : vector<32x256xf32>, i32 -> vector<32x256xf32>
    %c0_42 = arith.constant 0 : index
    %c768_43 = arith.constant 768 : index
    %125 = vector.load %arg10[%c0_42, %c768_43] : memref<32x2304xf32, #tpu.memory_space<vmem>>, vector<32x256xf32>
    %126 = arith.mulf %125, %124 : vector<32x256xf32>
    %127 = arith.addf %123, %126 : vector<32x256xf32>
    %c0_44 = arith.constant 0 : index
    %c1024_45 = arith.constant 1024 : index
    %128 = vector.load %arg10[%c0_44, %c1024_45] : memref<32x2304xf32, #tpu.memory_space<vmem>>, vector<32x256xf32>
    %129 = arith.mulf %128, %6 : vector<32x256xf32>
    %130 = arith.addf %127, %129 : vector<32x256xf32>
    %c255_i32_46 = arith.constant 255 : i32
    %131 = tpu.dynamic_rotate %6 by %c255_i32_46 dim 1 : vector<32x256xf32>, i32 -> vector<32x256xf32>
    %c0_47 = arith.constant 0 : index
    %c1280_48 = arith.constant 1280 : index
    %132 = vector.load %arg10[%c0_47, %c1280_48] : memref<32x2304xf32, #tpu.memory_space<vmem>>, vector<32x256xf32>
    %133 = arith.mulf %132, %131 : vector<32x256xf32>
    %134 = arith.addf %130, %133 : vector<32x256xf32>
    %c241_i32_49 = arith.constant 241 : i32
    %135 = tpu.dynamic_rotate %6 by %c241_i32_49 dim 1 : vector<32x256xf32>, i32 -> vector<32x256xf32>
    %c0_50 = arith.constant 0 : index
    %c1536_51 = arith.constant 1536 : index
    %136 = vector.load %arg10[%c0_50, %c1536_51] : memref<32x2304xf32, #tpu.memory_space<vmem>>, vector<32x256xf32>
    %137 = arith.mulf %136, %135 : vector<32x256xf32>
    %138 = arith.addf %134, %137 : vector<32x256xf32>
    %c240_i32_52 = arith.constant 240 : i32
    %139 = tpu.dynamic_rotate %6 by %c240_i32_52 dim 1 : vector<32x256xf32>, i32 -> vector<32x256xf32>
    %c0_53 = arith.constant 0 : index
    %c1792_54 = arith.constant 1792 : index
    %140 = vector.load %arg10[%c0_53, %c1792_54] : memref<32x2304xf32, #tpu.memory_space<vmem>>, vector<32x256xf32>
    %141 = arith.mulf %140, %139 : vector<32x256xf32>
    %142 = arith.addf %138, %141 : vector<32x256xf32>
    %c239_i32_55 = arith.constant 239 : i32
    %143 = tpu.dynamic_rotate %6 by %c239_i32_55 dim 1 : vector<32x256xf32>, i32 -> vector<32x256xf32>
    %c0_56 = arith.constant 0 : index
    %c2048_57 = arith.constant 2048 : index
    %144 = vector.load %arg10[%c0_56, %c2048_57] : memref<32x2304xf32, #tpu.memory_space<vmem>>, vector<32x256xf32>
    %145 = arith.mulf %144, %143 : vector<32x256xf32>
    %146 = arith.addf %142, %145 : vector<32x256xf32>
    %c0_58 = arith.constant 0 : index
    %c0_59 = arith.constant 0 : index
    %147 = vector.load %arg3[%c0_58, %c0_59] : memref<4x32xf32, #tpu.memory_space<vmem>>, vector<4x32xf32>
    %cst_60 = arith.constant dense<0.000000e+00> : vector<4x256xf32>
    %148 = tpu.matmul %147, %146, %cst_60 {dimension_numbers = #tpu.dot_dimension_numbers<[1], [0], [0], [1], [0, 0, 1, 1], [], []>} : vector<4x32xf32>, vector<32x256xf32>, vector<4x256xf32> -> vector<4x256xf32>
    %c0_61 = arith.constant 0 : index
    %c0_62 = arith.constant 0 : index
    %149 = vector.load %arg4[%c0_61, %c0_62] : memref<4x1xf32, #tpu.memory_space<vmem>>, vector<4x1xf32>
    %150 = vector.broadcast %149 : vector<4x1xf32> to vector<4x256xf32>
    %151 = arith.addf %148, %150 : vector<4x256xf32>
    %c0_63 = arith.constant 0 : index
    %c0_64 = arith.constant 0 : index
    %c0_65 = arith.constant 0 : index
    %152 = vector.load %arg8[%c0_63, %c0_64, %c0_65] : memref<1x4x256xf32, #tpu.memory_space<vmem>>, vector<1x4x256xf32>
    %153 = vector.shape_cast %152 : vector<1x4x256xf32> to vector<4x256xf32>
    %154 = vector.shape_cast %151 : vector<4x256xf32> to vector<1x4x256xf32>
    tpu.vector_store %arg8[%c0_63, %c0_64, %c0_65], %154 {strides = array<i32>} : memref<1x4x256xf32, #tpu.memory_space<vmem>>, vector<1x4x256xf32>,
    return
  }
  func.func @transform_0(%arg0: i32) -> (i32, i32, i32) {
    %c0_i32 = arith.constant 0 : i32
    %c0_i32_0 = arith.constant 0 : i32
    %c0_i32_1 = arith.constant 0 : i32
    return %arg0, %c0_i32, %c0_i32_0 : i32, i32, i32
  }
  func.func @transform_1(%arg0: i32) -> (i32, i32) {
    %c0_i32 = arith.constant 0 : i32
    %c0_i32_0 = arith.constant 0 : i32
    %c0_i32_1 = arith.constant 0 : i32
    return %c0_i32, %c0_i32_0 : i32, i32
  }
  func.func @transform_2(%arg0: i32) -> (i32, i32) {
    %c0_i32 = arith.constant 0 : i32
    %c0_i32_0 = arith.constant 0 : i32
    %c0_i32_1 = arith.constant 0 : i32
    return %c0_i32, %c0_i32_0 : i32, i32
  }
  func.func @transform_3(%arg0: i32) -> (i32, i32) {
    %c0_i32 = arith.constant 0 : i32
    %c0_i32_0 = arith.constant 0 : i32
    %c0_i32_1 = arith.constant 0 : i32
    return %c0_i32, %c0_i32_0 : i32, i32
  }
  func.func @transform_4(%arg0: i32) -> (i32, i32) {
    %c0_i32 = arith.constant 0 : i32
    %c0_i32_0 = arith.constant 0 : i32
    %c0_i32_1 = arith.constant 0 : i32
    return %c0_i32, %c0_i32_0 : i32, i32
  }
  func.func @transform_5(%arg0: i32) -> (i32, i32) {
    %c0_i32 = arith.constant 0 : i32
    %c0_i32_0 = arith.constant 0 : i32
    %c0_i32_1 = arith.constant 0 : i32
    return %c0_i32, %c0_i32_0 : i32, i32
  }
  func.func @transform_6(%arg0: i32) -> (i32, i32) {
    %c0_i32 = arith.constant 0 : i32
    %c0_i32_0 = arith.constant 0 : i32
    %c0_i32_1 = arith.constant 0 : i32
    return %c0_i32, %c0_i32_0 : i32, i32
  }
  func.func @transform_7(%arg0: i32) -> (i32, i32, i32) {
    %c0_i32 = arith.constant 0 : i32
    %c0_i32_0 = arith.constant 0 : i32
    %c0_i32_1 = arith.constant 0 : i32
    return %arg0, %c0_i32, %c0_i32_0 : i32, i32, i32
  }
  func.func @transform_8(%arg0: i32) -> (i32, i32, i32) {
    %c0_i32 = arith.constant 0 : i32
    %c0_i32_0 = arith.constant 0 : i32
    %c0_i32_1 = arith.constant 0 : i32
    return %arg0, %c0_i32, %c0_i32_0 : i32, i32, i32
  }
}

</mosaic_0001>

<bundles_post_ra>
// kernel: conv_attention2d_forward.1
= control target key start
LH: loop header
LB: loop body
LE: loop exit
PB: predicated region body
PF: predicated region fallthrough
CT: control target
= control target key end

     0   :  { %s3038_s27 = smov 0   ;;  %s4725_s0 = inlined_call_operand.vmem [shape: f32[2,4,256], index: 0, kind: input, shape index: {}]   ;;  %s4726_s1 = inlined_call_operand.vmem [shape: f32[96,4], index: 1, kind: input, shape index: {}]   ;;  %s4727_s2 = inlined_call_operand.vmem [shape: f32[4,32], index: 2, kind: input, shape index: {}]   ;;  %s4728_s3 = inlined_call_operand.vmem [shape: f32[4,1], index: 3, kind: input, shape index: {}]   ;;  %s4729_s4 = inlined_call_operand.vmem [shape: f32[2,32], index: 4, kind: input, shape index: {}]   ;;  %s4730_s5 = inlined_call_operand.vmem [shape: f32[32,2], index: 5, kind: input, shape index: {}]   ;;  %s4731_s6 = inlined_call_operand.vmem [shape: f32[1,2304], index: 6, kind: input, shape index: {}]   ;;  %s4732_s7 = inlined_call_operand.vmem [shape: f32[2,4,256], index: 7, kind: output, shape index: {0}]   ;;  %s4733_s8 = inlined_call_operand.vmem [shape: f32[2,2,2304], index: 8, kind: output, shape index: {1}]  }
   0x1 LB: > { %s2766_s28 = sadd.s32 4294967295, %s2982_s27   ;;  %p2770_p0 = scmp.ge.s32.totalorder %s2982_s27, 1  ;;  %s2982_s27 = sphi %s3038_s27, %s19_s27  }
   0x2   : > { %p265_p1 = scmp.lt.s32.totalorder %s2982_s27, 3 }
   0x4   : > { %p266_p2 = pnand %p2770_p0, %p265_p1 }
   0x6   : > { %269 = sbr.rel (%p266_p2) target bundleno = 1081 (0x439), region = 48 }
   0xb   : > { %p304_p3 = scmp.lt.s32.totalorder %s2766_s28, 1  ;;  %vm373_vm0 = vcmask 1043456   ;;  %v320_v1 = vld [vmem:[%s4726_s1] sm:$0xff]  ;;  %vm336_vm1 = vcmask 31744   ;;  %v321_v4 = vld [vmem:[%s4726_s1 + $0x8] sm:$0xff]  ;;  %v322_v5 = vld [vmem:[%s4726_s1 + $0x10] sm:$0xff]  ;;  %v500_v29 = vlaneseq }
   0xc   : > { %v323_v6 = vld [vmem:[%s4726_s1 + $0x18] sm:$0xff]  ;;  %v324_v7 = vld [vmem:[%s4726_s1 + $0x20] sm:$0xff]  ;;  %v325_v8 = vld [vmem:[%s4726_s1 + $0x28] sm:$0xff]  ;;  %s2984_s30 = smov 17   ;;  %s2985_s9 = smov 16   ;;  %vm903_vm8 = vcmask 261120  }
   0xd   : > { %s4754_s28 = smov (!%p304_p3, %s2766_s28), 1  ;;  %v326_v9 = vld [vmem:[%s4726_s1 + $0x30] sm:$0xff]  ;;  %v327_v10 = vld [vmem:[%s4726_s1 + $0x38] sm:$0xff]  ;;  %s2987_s11 = smov 1   ;;  %v3212_v31 = vand.u32 127, %v500_v29  ;;  %v328_v49 = vld [vmem:[%s4726_s1 + $0x40] sm:$0xff] }
   0xe   : > { %s2914_s29 = sshll.u32 %s4754_s28, 3  ;;  %s2988_s12 = smov 127   ;;  %v329_v56 = vld [vmem:[%s4726_s1 + $0x48] sm:$0xff]  ;;  %vm1464_vm11 = vcmask 1041408   ;;  %vm1553_vm12 = vcmask 15360   ;;  %vm1466_vm13 = vcmask 1045508  }
   0xf   : > { %s308_s10 = scalar_lea.vmem %s4725_s0, %s2914_s29  ;;  %s2989_s13 = smov 113   ;;  %vm502_vm2 = vcmp.lt.s32.totalorder %v3212_v31, 17  ;;  %vm584_vm3 = vcmp.lt.s32.totalorder %v3212_v31, 15  ;;  %vm543_vm4 = vcmp.lt.s32.totalorder %v3212_v31, 16  ;;  %vm625_vm5 = vcmp.lt.s32.totalorder %v3212_v31, 1 }
  0x10   : > { %v319_v0 = vld [vmem:[%s308_s10] sm:$0xff]  ;;  %s2986_s10 = smov 15   ;;  %s2990_s14 = smov 112   ;;  %vm723_vm6 = vcmp.lt.s32.totalorder %v3212_v31, 113  ;;  %vm682_vm7 = vcmp.lt.s32.totalorder %v3212_v31, 127  ;;  %vm764_vm9 = vcmp.lt.s32.totalorder %v3212_v31, 112 }
  0x11   : > { %333 = vst [vmem:[#allocation1] ss:$2 sm:$0xff] %v319_v0  ;;  %s2991_s19 = smov 111   ;;  %vm805_vm10 = vcmp.lt.s32.totalorder %v3212_v31, 111  ;;  %s2916_s15 = smul.u32 36, %s4754_s28 }
  0x13   : > { %s4011_s18 = scalar_lea.vmem %s4733_s8, %s2916_s15 }
  0x18   : > { %v334_v2 = vld.sshfl [vmem:[#allocation1] sm:$0xff pattern:$0x75316420]  ;;  %v335_v3 = vld.sshfl [vmem:[#allocation1 + $0x8] sm:$0xff pattern:$0x75316420] }
  0x19   : > { %2776 = vmatpush.msk.msra.mxu0 %vm373_vm0, %v334_v2  ;;  %2789 = vmatpush.msk.msra.mxu1 %vm373_vm0, %v335_v3 }
  0x1a   : > { %2777 = vmatmul.msk.f32.vlgmr.msra.gmra.mxu0 %vm336_vm1, %v320_v1  ;;  %2790 = vmatmul.msk.f32.vlgmr.msra.gmra.mxu1 %vm336_vm1, %v320_v1  ;;  %v330_v1 = vld [vmem:[%s4726_s1 + $0x50] sm:$0xff] }
  0x22   : > { %2778 = vmatmul.msk.f32.gmra.mxu0 %vm336_vm1, %v321_v4  ;;  %2791 = vmatmul.msk.f32.gmra.mxu1 %vm336_vm1, %v321_v4 }
  0x2a   : > { %2779 = vmatmul.msk.f32.gmra.mxu0 %vm336_vm1, %v322_v5  ;;  %2792 = vmatmul.msk.f32.gmra.mxu1 %vm336_vm1, %v322_v5 }
  0x32   : > { %2780 = vmatmul.msk.f32.gmra.mxu0 %vm336_vm1, %v323_v6  ;;  %2793 = vmatmul.msk.f32.gmra.mxu1 %vm336_vm1, %v323_v6 }
  0x3a   : > { %2781 = vmatmul.msk.f32.gmra.mxu0 %vm336_vm1, %v324_v7  ;;  %2794 = vmatmul.msk.f32.gmra.mxu1 %vm336_vm1, %v324_v7 }
  0x42   : > { %2782 = vmatmul.msk.f32.gmra.mxu0 %vm336_vm1, %v325_v8  ;;  %2795 = vmatmul.msk.f32.gmra.mxu1 %vm336_vm1, %v325_v8 }
  0x4a   : > { %2783 = vmatmul.msk.f32.gmra.mxu0 %vm336_vm1, %v326_v9  ;;  %2796 = vmatmul.msk.f32.gmra.mxu1 %vm336_vm1, %v326_v9 }
  0x52   : > { %2784 = vmatmul.msk.f32.gmra.mxu0 %vm336_vm1, %v327_v10  ;;  %2797 = vmatmul.msk.f32.gmra.mxu1 %vm336_vm1, %v327_v10 }
  0x5a   : > { %2785 = vmatmul.msk.f32.gmra.mxu0 %vm336_vm1, %v328_v49  ;;  %2798 = vmatmul.msk.f32.gmra.mxu1 %vm336_vm1, %v328_v49 }
  0x62   : > { %2786 = vmatmul.msk.f32.gmra.mxu0 %vm336_vm1, %v329_v56  ;;  %2799 = vmatmul.msk.f32.gmra.mxu1 %vm336_vm1, %v329_v56 }
  0x6a   : > { %2787 = vmatmul.msk.f32.gmra.mxu0 %vm336_vm1, %v330_v1  ;;  %2800 = vmatmul.msk.f32.gmra.mxu1 %vm336_vm1, %v330_v1 }
  0x97   : > { %v3096_v11 = vpop.f32.mrf.mxu0  ;;  %v3098_v12 = vpop.f32.mrf.mxu1 }
  0x9f   : > { %v3100_v13 = vpop.f32.mrf.mxu0  ;;  %v3102_v14 = vpop.f32.mrf.mxu1 }
  0xa7   : > { %v3104_v15 = vpop.f32.mrf.mxu0  ;;  %v3106_v16 = vpop.f32.mrf.mxu1 }
  0xaf   : > { %v3108_v17 = vpop.f32.mrf.mxu0  ;;  %v3110_v18 = vpop.f32.mrf.mxu1 }
  0xb7   : > { %v3112_v19 = vpop.f32.mrf.mxu0  ;;  %v3114_v20 = vpop.f32.mrf.mxu1 }
  0xb8   : > { %492 = vrot.lane.b32.xlu1 %v3114_v20, %s2984_s30  ;;  %527 = vrot.lane.b32.xlu2 %v3112_v19, %s2985_s9 }
  0xb9   : > { %484 = vrot.lane.b32.xlu0 %v3112_v19, %s2984_s30 }
  0xbf   : > { %v3140_v21 = vpop.f32.mrf.mxu0  ;;  %v3142_v22 = vpop.f32.mrf.mxu1 }
  0xc0   : > { %568 = vrot.lane.b32.xlu1 %v3112_v19, %s2986_s10  ;;  %576 = vrot.lane.b32.xlu2 %v3114_v20, %s2986_s10 }
  0xc1   : > { %535 = vrot.lane.b32.xlu0 %v3114_v20, %s2985_s9 }
  0xc7   : > { %v3162_v23 = vpop.f32.mrf.mxu0  ;;  %v3170_v24 = vpop.f32.mrf.mxu1 }
  0xc8   : > { %617 = vrot.lane.b32.xlu1 %v3114_v20, %s2987_s11  ;;  %666 = vrot.lane.b32.xlu2 %v3112_v19, %s2988_s12 }
  0xc9   : > { %609 = vrot.lane.b32.xlu0 %v3112_v19, %s2987_s11 }
  0xcf   : > { %v3190_v25 = vpop.f32.mrf.mxu0  ;;  %v3198_v27 = vpop.f32.mrf.mxu1 }
  0xd0   : > { %707 = vrot.lane.b32.xlu1 %v3112_v19, %s2989_s13  ;;  %715 = vrot.lane.b32.xlu2 %v3114_v20, %s2989_s13 }
  0xd1   : > { %674 = vrot.lane.b32.xlu0 %v3114_v20, %s2988_s12 }
  0xd8   : > { %537 = vrot.lane.b32.xlu1 %v3142_v22, %s2985_s9  ;;  %486 = vrot.lane.b32.xlu2 %v3140_v21, %s2984_s30 }
  0xd9   : > { %529 = vrot.lane.b32.xlu0 %v3140_v21, %s2985_s9 }
  0xe0   : > { %611 = vrot.lane.b32.xlu1 %v3140_v21, %s2987_s11  ;;  %494 = vrot.lane.b32.xlu2 %v3142_v22, %s2984_s30 }
  0xe1   : > { %578 = vrot.lane.b32.xlu0 %v3142_v22, %s2986_s10 }
  0xe8   : > { %676 = vrot.lane.b32.xlu1 %v3142_v22, %s2988_s12  ;;  %570 = vrot.lane.b32.xlu2 %v3140_v21, %s2986_s10 }
  0xe9   : > { %668 = vrot.lane.b32.xlu0 %v3140_v21, %s2988_s12 }
  0xf0   : > { %619 = vrot.lane.b32.xlu2 %v3142_v22, %s2987_s11  ;;  %488 = vrot.lane.b32.xlu1 %v3162_v23, %s2984_s30 }
  0xf1   : > { %717 = vrot.lane.b32.xlu0 %v3142_v22, %s2989_s13 }
  0xf8   : > { %709 = vrot.lane.b32.xlu2 %v3140_v21, %s2989_s13  ;;  %496 = vrot.lane.b32.xlu1 %v3170_v24, %s2984_s30 }
  0xf9   : > { %572 = vrot.lane.b32.xlu0 %v3162_v23, %s2986_s10 }
 0x100   : > { %539 = vrot.lane.b32.xlu2 %v3170_v24, %s2985_s9  ;;  %531 = vrot.lane.b32.xlu1 %v3162_v23, %s2985_s9 }
 0x101   : > { %621 = vrot.lane.b32.xlu0 %v3170_v24, %s2987_s11 }
 0x108   : > { %613 = vrot.lane.b32.xlu2 %v3162_v23, %s2987_s11  ;;  %580 = vrot.lane.b32.xlu1 %v3170_v24, %s2986_s10 }
 0x109   : > { %711 = vrot.lane.b32.xlu0 %v3162_v23, %s2989_s13 }
 0x110   : > { %678 = vrot.lane.b32.xlu2 %v3170_v24, %s2988_s12  ;;  %670 = vrot.lane.b32.xlu1 %v3162_v23, %s2988_s12 }
 0x111   : > { %490 = vrot.lane.b32.xlu0 %v3190_v25, %s2984_s30 }
 0x112   : > { %v528_v26 = vpop.permute.xlu2 %527 }
 0x118   : > { %719 = vrot.lane.b32.xlu1 %v3170_v24, %s2989_s13  ;;  %533 = vrot.lane.b32.xlu2 %v3190_v25, %s2985_s9 }
 0x119   : > { %498 = vrot.lane.b32.xlu0 %v3198_v27, %s2984_s30 }
 0x11a   : > { %v577_v28 = vpop.permute.xlu2 %576 }
 0x120   : > { %574 = vrot.lane.b32.xlu1 %v3190_v25, %s2986_s10  ;;  %582 = vrot.lane.b32.xlu2 %v3198_v27, %s2986_s10 }
 0x121   : > { %541 = vrot.lane.b32.xlu0 %v3198_v27, %s2985_s9 }
 0x122   : > { %v667_v30 = vpop.permute.xlu2 %666 }
 0x128   : > { %623 = vrot.lane.b32.xlu1 %v3198_v27, %s2987_s11  ;;  %752 = vrot.lane.b32.xlu2 %v3162_v23, %s2990_s14 }
 0x129   : > { %760 = vrot.lane.b32.xlu0 %v3170_v24, %s2990_s14 }
 0x12a   : > { %v493_v32 = vpop.permute.xlu1 %492  ;;  %v716_v33 = vpop.permute.xlu2 %715 }
 0x12b   : > { %v485_v34 = vpop.permute.xlu0 %484 }
 0x12c   : > { %v3223_v35 = vsel %vm502_vm2, %v485_v34, %v493_v32  ;;  %v3227_v36 = vsel %vm502_vm2, %v493_v32, %v485_v34 }
 0x130   : > { %750 = vrot.lane.b32.xlu1 %v3140_v21, %s2990_s14  ;;  %758 = vrot.lane.b32.xlu2 %v3142_v22, %s2990_s14 }
 0x131   : > { %615 = vrot.lane.b32.xlu0 %v3190_v25, %s2987_s11 }
 0x132   : > { %v569_v37 = vpop.permute.xlu1 %568  ;;  %v3245_v41 = vpop.permute.xlu2 %486 }
 0x133   : > { %v3239_v38 = vsel %vm584_vm3, %v569_v37, %v577_v28  ;;  %v3243_v39 = vsel %vm584_vm3, %v577_v28, %v569_v37  ;;  %v536_v40 = vpop.permute.xlu0 %535  ;;  %v331_v28 = vld [vmem:[%s4726_s1 + $0x58] sm:$0xff] }
 0x134   : > { %v3249_v42 = vsel %vm543_vm4, %v528_v26, %v536_v40  ;;  %v3253_v43 = vsel %vm543_vm4, %v536_v40, %v528_v26  ;;  %2801 = vmatmul.msk.f32.gmra.mxu1 %vm336_vm1, %v331_v28  ;;  %2788 = vmatmul.msk.f32.gmra.mxu0 %vm336_vm1, %v331_v28 }
 0x138   : > { %756 = vrot.lane.b32.xlu1 %v3114_v20, %s2990_s14  ;;  %672 = vrot.lane.b32.xlu2 %v3190_v25, %s2988_s12 }
 0x139   : > { %748 = vrot.lane.b32.xlu0 %v3112_v19, %s2990_s14 }
 0x13a   : > { %v618_v44 = vpop.permute.xlu1 %617  ;;  %v3270_v48 = vpop.permute.xlu2 %494 }
 0x13b   : > { %v610_v45 = vpop.permute.xlu0 %609  ;;  %v504_v28 = vsel %vm502_vm2, %v3245_v41, %v3270_v48 }
 0x13c   : > { %v3264_v46 = vsel %vm625_vm5, %v610_v45, %v618_v44  ;;  %v3268_v47 = vsel %vm625_vm5, %v618_v44, %v610_v45 }
 0x140   : > { %713 = vrot.lane.b32.xlu1 %v3190_v25, %s2989_s13  ;;  %721 = vrot.lane.b32.xlu2 %v3198_v27, %s2989_s13 }
 0x141   : > { %680 = vrot.lane.b32.xlu0 %v3198_v27, %s2988_s12 }
 0x142   : > { %v708_v50 = vpop.permute.xlu1 %707  ;;  %v3304_v57 = vpop.permute.xlu2 %570 }
 0x143   : > { %v3287_v51 = vsel %vm723_vm6, %v708_v50, %v716_v33  ;;  %v3291_v52 = vsel %vm723_vm6, %v716_v33, %v708_v50  ;;  %v675_v53 = vpop.permute.xlu0 %674 }
 0x144   : > { %4735 = vst [vmem:[#allocation3_spill] sm:$0xff] %v3287_v51  ;;  %v3295_v54 = vsel %vm682_vm7, %v667_v30, %v675_v53  ;;  %v3299_v55 = vsel %vm682_vm7, %v675_v53, %v667_v30  ;;  %v511_v51 = vmul.f32 %v3227_v36, %v3096_v11 }
 0x145   : > { %4736 = vst [vmem:[#allocation4_spill] sm:$0xff] %v3291_v52 }
 0x148   : > { %762 = vrot.lane.b32.xlu1 %v3198_v27, %s2990_s14  ;;  %801 = vrot.lane.b32.xlu2 %v3170_v24, %s2991_s19 }
 0x149   : > { %754 = vrot.lane.b32.xlu0 %v3190_v25, %s2990_s14 }
 0x14a   : > { %v538_v58 = vpop.permute.xlu1 %537  ;;  %v3326_v62 = vpop.permute.xlu2 %619 }
 0x14b   : > { %v530_v59 = vpop.permute.xlu0 %529 }
 0x14c   : > { %v3316_v60 = vsel %vm543_vm4, %v530_v59, %v538_v58  ;;  %v3320_v61 = vsel %vm543_vm4, %v538_v58, %v530_v59 }
 0x150   : > { %793 = vrot.lane.b32.xlu1 %v3162_v23, %s2991_s19  ;;  %795 = vrot.lane.b32.xlu2 %v3190_v25, %s2991_s19 }
 0x151   : > { %791 = vrot.lane.b32.xlu0 %v3140_v21, %s2991_s19 }
 0x152   : > { %v3330_v63 = vpop.permute.xlu1 %611  ;;  %v710_v3 = vpop.permute.xlu2 %709 }
 0x153   : > { %v3332_v0 = vpop.permute.xlu0 %578 }
 0x158   : > { %799 = vrot.lane.b32.xlu1 %v3142_v22, %s2991_s19  ;;  %789 = vrot.lane.b32.xlu2 %v3112_v19, %s2991_s19 }
 0x159   : > { %803 = vrot.lane.b32.xlu0 %v3198_v27, %s2991_s19 }
 0x15a   : > { %v677_v2 = vpop.permute.xlu1 %676  ;;  %v540_v26 = vpop.permute.xlu2 %539 }
 0x15b   : > { %v669_v4 = vpop.permute.xlu0 %668 }
 0x15c   : > { %v3347_v5 = vsel %vm682_vm7, %v669_v4, %v677_v2  ;;  %v3351_v6 = vsel %vm682_vm7, %v677_v2, %v669_v4 }
 0x161   : > { %797 = vrot.lane.b32.xlu0 %v3114_v20, %s2991_s19 }
 0x162   : > { %v489_v7 = vpop.permute.xlu1 %488  ;;  %v3370_v32 = vpop.permute.xlu2 %613 }
 0x163   : > { %v718_v8 = vpop.permute.xlu0 %717 }
 0x164   : > { %v3357_v9 = vsel %vm723_vm6, %v710_v3, %v718_v8  ;;  %v3361_v10 = vsel %vm723_vm6, %v718_v8, %v710_v3 }
 0x16a   : > { %v497_v29 = vpop.permute.xlu1 %496  ;;  %v3374_v37 = vpop.permute.xlu2 %678 }
 0x16b   : > { %v3368_v30 = vpop.permute.xlu0 %572  ;;  %v505_v58 = vsel %vm502_vm2, %v489_v7, %v497_v29  ;;  %v509_v59 = vsel %vm502_vm2, %v497_v29, %v489_v7  ;;  %v508_v7 = vsel %vm502_vm2, %v3270_v48, %v3245_v41  ;;  %v512_v41 = vmul.f32 %v3223_v35, %v3098_v12  ;;  %v3411_v48 = vld [vmem:[%s4729_s4] sm:$0x3] }
 0x16c   : > { %v515_v29 = vmul.f32 %v509_v59, %v3104_v15 }
 0x172   : > { %v532_v33 = vpop.permute.xlu1 %531  ;;  %v534_v49 = vpop.permute.xlu2 %533 }
 0x173   : > { %v3372_v34 = vpop.permute.xlu0 %621  ;;  %v550_v59 = vsel %vm543_vm4, %v540_v26, %v532_v33 }
 0x17a   : > { %v581_v40 = vpop.permute.xlu1 %580  ;;  %v583_v3 = vpop.permute.xlu2 %582 }
 0x17b   : > { %v3376_v44 = vpop.permute.xlu0 %711 }
 0x182   : > { %v3378_v45 = vpop.permute.xlu1 %670 }
 0x183   : > { %v491_v50 = vpop.permute.xlu0 %490 }
 0x18a   : > { %v3380_v53 = vpop.permute.xlu1 %719 }
 0x18b   : > { %v499_v56 = vpop.permute.xlu0 %498 }
 0x18c   : > { %v510_v1 = vsel %vm502_vm2, %v499_v56, %v491_v50  ;;  %v506_v2 = vsel %vm502_vm2, %v491_v50, %v499_v56  ;;  %v516_v50 = vmul.f32 %v505_v58, %v3106_v16  ;;  %v513_v56 = vmul.f32 %v508_v7, %v3100_v13 }
 0x18d   : > { %v517_v4 = vmul.f32 %v510_v1, %v3108_v17  ;;  %v518_v8 = vmul.f32 %v506_v2, %v3110_v18  ;;  %v514_v1 = vmul.f32 %v504_v28, %v3102_v14  ;;  %v546_v58 = vsel %vm543_vm4, %v532_v33, %v540_v26  ;;  %v3427_v28 = vpop.permute.xlu2 %752 }
 0x18e   : > { %v556_v26 = vmul.f32 %v550_v59, %v3104_v15  ;;  %v555_v33 = vmul.f32 %v3316_v60, %v3102_v14  ;;  %v587_v60 = vsel %vm584_vm3, %v3368_v30, %v581_v40 }
 0x18f   : > { %919 = vmatpush.msra.mxu2 %v517_v4  ;;  %939 = vmatpush.msra.mxu3 %v518_v8 }
 0x191   : > { %920 = vmatpush.msra.mxu2 %v515_v29  ;;  %940 = vmatpush.msra.mxu3 %v516_v50 }
 0x192   : > { %v575_v2 = vpop.permute.xlu1 %574 }
 0x193   : > { %921 = vmatpush.msra.mxu2 %v513_v56  ;;  %941 = vmatpush.msra.mxu3 %v514_v1  ;;  %v542_v52 = vpop.permute.xlu0 %541  ;;  %v592_v7 = vsel %vm584_vm3, %v583_v3, %v575_v2  ;;  %v552_v56 = vmul.f32 %v3253_v43, %v3096_v11  ;;  %v591_v1 = vsel %vm584_vm3, %v581_v40, %v3368_v30 }
 0x194   : > { %v547_v4 = vsel %vm543_vm4, %v534_v49, %v542_v52  ;;  %v551_v36 = vsel %vm543_vm4, %v542_v52, %v534_v49  ;;  %v557_v52 = vmul.f32 %v546_v58, %v3106_v16  ;;  %v588_v49 = vsel %vm584_vm3, %v575_v2, %v583_v3 }
 0x195   : > { %922 = vmatpush.msra.mxu2 %v511_v51  ;;  %942 = vmatpush.msra.mxu3 %v512_v41  ;;  %v558_v35 = vmul.f32 %v551_v36, %v3108_v17  ;;  %v559_v8 = vmul.f32 %v547_v4, %v3110_v18  ;;  %v554_v51 = vmul.f32 %v3320_v61, %v3100_v13  ;;  %v3469_v59 = vpop.permute.xlu2 %758 }
 0x196   : > { %2802 = vmatmul.msk.f32.vlgmr.msra.gmra.mxu2 %vm903_vm8, %v3411_v48  ;;  %2803 = vmatmul.msk.f32.vlgmr.msra.gmra.mxu3 %vm903_vm8, %v3411_v48  ;;  %v553_v61 = vmul.f32 %v3249_v42, %v3098_v12  ;;  %v599_v3 = vmul.f32 %v592_v7, %v3108_v17  ;;  %v600_v2 = vmul.f32 %v588_v49, %v3110_v18 }
 0x197   : > { %959 = vmatpush.msrb.mxu2 %v558_v35  ;;  %979 = vmatpush.msrb.mxu3 %v559_v8  ;;  %v586_v43 = vsel %vm584_vm3, %v3304_v57, %v3332_v0  ;;  %v590_v42 = vsel %vm584_vm3, %v3332_v0, %v3304_v57  ;;  %v597_v30 = vmul.f32 %v591_v1, %v3104_v15 }
 0x198   : > { %v598_v40 = vmul.f32 %v587_v60, %v3106_v16  ;;  %v595_v41 = vmul.f32 %v590_v42, %v3100_v13  ;;  %v596_v58 = vmul.f32 %v586_v43, %v3102_v14  ;;  %v593_v0 = vmul.f32 %v3243_v39, %v3096_v11 }
 0x199   : > { %960 = vmatpush.msrb.mxu2 %v556_v26  ;;  %980 = vmatpush.msrb.mxu3 %v557_v52  ;;  %v594_v4 = vmul.f32 %v3239_v38, %v3098_v12  ;;  %v628_v35 = vsel %vm625_vm5, %v3370_v32, %v3372_v34  ;;  %v632_v8 = vsel %vm625_vm5, %v3372_v34, %v3370_v32 }
 0x19a   : > { %v624_v29 = vpop.permute.xlu1 %623  ;;  %v631_v32 = vsel %vm625_vm5, %v3326_v62, %v3330_v63  ;;  %v638_v34 = vmul.f32 %v632_v8, %v3104_v15  ;;  %v656_v60 = vmul.f32 %v3190_v25, %v3108_v17  ;;  %v657_v1 = vmul.f32 %v3198_v27, %v3110_v18 }
 0x19b   : > { %961 = vmatpush.msrb.mxu2 %v554_v51  ;;  %981 = vmatpush.msrb.mxu3 %v555_v33  ;;  %v3439_v50 = vpop.permute.xlu0 %760  ;;  %v627_v51 = vsel %vm625_vm5, %v3330_v63, %v3326_v62  ;;  %v639_v33 = vmul.f32 %v628_v35, %v3106_v16  ;;  %v636_v49 = vmul.f32 %v631_v32, %v3100_v13 }
 0x19c   : > { %v637_v7 = vmul.f32 %v627_v51, %v3102_v14  ;;  %v634_v62 = vmul.f32 %v3268_v47, %v3096_v11  ;;  %v635_v63 = vmul.f32 %v3264_v46, %v3098_v12  ;;  %v654_v46 = vmul.f32 %v3162_v23, %v3104_v15 }
 0x19d   : > { %962 = vmatpush.msrb.mxu2 %v552_v56  ;;  %982 = vmatpush.msrb.mxu3 %v553_v61  ;;  %v673_v56 = vpop.permute.xlu2 %672  ;;  %v655_v47 = vmul.f32 %v3170_v24, %v3106_v16  ;;  %v652_v25 = vmul.f32 %v3140_v21, %v3100_v13  ;;  %v653_v27 = vmul.f32 %v3142_v22, %v3102_v14 }
 0x19e   : > { %2804 = vmatmul.msk.f32.vlgmr.msrb.gmra.mxu2 %vm903_vm8, %v3411_v48  ;;  %2805 = vmatmul.msk.f32.vlgmr.msrb.gmra.mxu3 %vm903_vm8, %v3411_v48  ;;  %v650_v43 = vmul.f32 %v3112_v19, %v3096_v11  ;;  %v651_v23 = vmul.f32 %v3114_v20, %v3098_v12  ;;  %v685_v24 = vsel %vm682_vm7, %v3378_v45, %v3374_v37 }
 0x19f   : > { %999 = vmatpush.msra.mxu2 %v599_v3  ;;  %1019 = vmatpush.msra.mxu3 %v600_v2  ;;  %v689_v21 = vsel %vm682_vm7, %v3374_v37, %v3378_v45  ;;  %v695_v37 = vmul.f32 %v685_v24, %v3104_v15  ;;  %v692_v35 = vmul.f32 %v3299_v55, %v3098_v12 }
 0x1a0   : > { %v696_v45 = vmul.f32 %v689_v21, %v3106_v16  ;;  %v730_v8 = vsel %vm723_vm6, %v3380_v53, %v3376_v44 }
 0x1a1   : > { %1000 = vmatpush.msra.mxu2 %v597_v30  ;;  %1020 = vmatpush.msra.mxu3 %v598_v40  ;;  %v693_v40 = vmul.f32 %v3347_v5, %v3100_v13 }
 0x1a2   : > { %v3471_v57 = vpop.permute.xlu1 %750 }
 0x1a3   : > { %1001 = vmatpush.msra.mxu2 %v595_v41  ;;  %1021 = vmatpush.msra.mxu3 %v596_v58  ;;  %v616_v36 = vpop.permute.xlu0 %615  ;;  %v694_v41 = vmul.f32 %v3351_v6, %v3102_v14  ;;  %v726_v6 = vsel %vm723_vm6, %v3376_v44, %v3380_v53  ;;  %v734_v44 = vmul.f32 %v3357_v9, %v3100_v13  ;;  %v3598_v9 = vpop.f32.mrf.mxu1 }
 0x1a4   : > { %v629_v26 = vsel %vm625_vm5, %v616_v36, %v624_v29  ;;  %v633_v39 = vsel %vm625_vm5, %v624_v29, %v616_v36  ;;  %v691_v36 = vmul.f32 %v3295_v54, %v3096_v11  ;;  %v736_v55 = vmul.f32 %v726_v6, %v3104_v15  ;;  %2222 = vrot.lane.b32.xlu2 %v3598_v9, %s2984_s30 }
 0x1a5   : > { %v640_v38 = vmul.f32 %v633_v39, %v3108_v17  ;;  %v641_v52 = vmul.f32 %v629_v26, %v3110_v18  ;;  %1002 = vmatpush.msra.mxu2 %v593_v0  ;;  %1022 = vmatpush.msra.mxu3 %v594_v4  ;;  %v722_v19 = vpop.permute.xlu2 %721  ;;  %v3575_v26 = vpop.f32.mrf.mxu0  ;;  %v735_v53 = vmul.f32 %v3361_v10, %v3102_v14 }
 0x1a6   : > { %2806 = vmatmul.msk.f32.vlgmr.msra.gmra.mxu2 %vm903_vm8, %v3411_v48  ;;  %2807 = vmatmul.msk.f32.vlgmr.msra.gmra.mxu3 %vm903_vm8, %v3411_v48 }
 0x1a7   : > { %1039 = vmatpush.msrb.mxu2 %v640_v38  ;;  %1059 = vmatpush.msrb.mxu3 %v641_v52  ;;  %v737_v38 = vmul.f32 %v730_v8, %v3106_v16 }
 0x1a8   : > { %2262 = vrot.lane.b32.xlu0 %v3575_v26, %s2985_s9  ;;  %2214 = vrot.lane.b32.xlu1 %v3575_v26, %s2984_s30 }
 0x1a9   : > { %1040 = vmatpush.msrb.mxu2 %v638_v34  ;;  %1060 = vmatpush.msrb.mxu3 %v639_v33  ;;  %v4737_v34 = vld [vmem:[#allocation3_spill] sm:$0xff] }
 0x1aa   : > { %v3507_v29 = vpop.permute.xlu1 %756  ;;  %v732_v33 = vmul.f32 %v4737_v34, %v3096_v11 }
 0x1ab   : > { %1041 = vmatpush.msrb.mxu2 %v636_v49  ;;  %1061 = vmatpush.msrb.mxu3 %v637_v7  ;;  %v3513_v61 = vpop.permute.xlu0 %748  ;;  %v4738_v7 = vld [vmem:[#allocation4_spill] sm:$0xff] }
 0x1ac   : > { %v733_v10 = vmul.f32 %v4738_v7, %v3098_v12 }
 0x1ad   : > { %1042 = vmatpush.msrb.mxu2 %v634_v62  ;;  %1062 = vmatpush.msrb.mxu3 %v635_v63  ;;  %v802_v52 = vpop.permute.xlu2 %801  ;;  %v767_v62 = vsel %vm764_vm9, %v3427_v28, %v3439_v50  ;;  %v771_v63 = vsel %vm764_vm9, %v3439_v50, %v3427_v28 }
 0x1ae   : > { %2808 = vmatmul.msk.f32.vlgmr.msrb.gmra.mxu2 %vm903_vm8, %v3411_v48  ;;  %2809 = vmatmul.msk.f32.vlgmr.msrb.gmra.mxu3 %vm903_vm8, %v3411_v48  ;;  %v777_v28 = vmul.f32 %v767_v62, %v3104_v15  ;;  %v778_v50 = vmul.f32 %v771_v63, %v3106_v16  ;;  %v3797_v62 = vld [vmem:[%s4731_s6 + $0x8] sm:$0xff] }
 0x1af   : > { %1079 = vmatpush.msra.mxu2 %v656_v60  ;;  %1099 = vmatpush.msra.mxu3 %v657_v1 }
 0x1b0   : > { %2270 = vrot.lane.b32.xlu1 %v3598_v9, %s2985_s9 }
 0x1b1   : > { %1080 = vmatpush.msra.mxu2 %v654_v46  ;;  %1100 = vmatpush.msra.mxu3 %v655_v47  ;;  %v766_v46 = vsel %vm764_vm9, %v3471_v57, %v3469_v59  ;;  %v770_v47 = vsel %vm764_vm9, %v3469_v59, %v3471_v57 }
 0x1b2   : > { %v714_v3 = vpop.permute.xlu1 %713  ;;  %v775_v59 = vmul.f32 %v766_v46, %v3100_v13  ;;  %v776_v57 = vmul.f32 %v770_v47, %v3102_v14 }
 0x1b3   : > { %1081 = vmatpush.msra.mxu2 %v652_v25  ;;  %1101 = vmatpush.msra.mxu3 %v653_v27  ;;  %v681_v2 = vpop.permute.xlu0 %680  ;;  %v727_v58 = vsel %vm723_vm6, %v714_v3, %v722_v19  ;;  %v731_v0 = vsel %vm723_vm6, %v722_v19, %v714_v3  ;;  %v3626_v25 = vpop.f32.mrf.mxu0  ;;  %v769_v27 = vsel %vm764_vm9, %v3507_v29, %v3513_v61 }
 0x1b4   : > { %v686_v22 = vsel %vm682_vm7, %v673_v56, %v681_v2  ;;  %v690_v42 = vsel %vm682_vm7, %v681_v2, %v673_v56  ;;  %v738_v54 = vmul.f32 %v727_v58, %v3108_v17  ;;  %v739_v39 = vmul.f32 %v731_v0, %v3110_v18  ;;  %2216 = vrot.lane.b32.xlu0 %v3626_v25, %s2984_s30 }
 0x1b5   : > { %v697_v30 = vmul.f32 %v686_v22, %v3108_v17  ;;  %v698_v20 = vmul.f32 %v690_v42, %v3110_v18  ;;  %1082 = vmatpush.msra.mxu2 %v650_v43  ;;  %1102 = vmatpush.msra.mxu3 %v651_v23  ;;  %v765_v3 = vsel %vm764_vm9, %v3513_v61, %v3507_v29  ;;  %v796_v2 = vpop.permute.xlu2 %795 }
 0x1b6   : > { %2810 = vmatmul.msk.f32.vlgmr.msra.gmra.mxu2 %vm903_vm8, %v3411_v48  ;;  %2811 = vmatmul.msk.f32.vlgmr.msra.gmra.mxu3 %vm903_vm8, %v3411_v48  ;;  %v774_v43 = vmul.f32 %v769_v27, %v3098_v12  ;;  %v773_v23 = vmul.f32 %v765_v3, %v3096_v11  ;;  %v1283_v3 = vperm.slane %v3797_v62, 2 }
 0x1b7   : > { %1119 = vmatpush.msrb.mxu2 %v697_v30  ;;  %1139 = vmatpush.msrb.mxu3 %v698_v20  ;;  %v3661_v20 = vpop.f32.mrf.mxu1 }
 0x1b8   : > { %2264 = vrot.lane.b32.xlu2 %v3626_v25, %s2985_s9  ;;  %2224 = vrot.lane.b32.xlu1 %v3661_v20, %s2984_s30 }
 0x1b9   : > { %1120 = vmatpush.msrb.mxu2 %v695_v37  ;;  %1140 = vmatpush.msrb.mxu3 %v696_v45 }
 0x1ba   : > { %v763_v4 = vpop.permute.xlu1 %762 }
 0x1bb   : > { %1141 = vmatpush.msrb.mxu3 %v694_v41  ;;  %v755_v5 = vpop.permute.xlu0 %754  ;;  %1121 = vmatpush.msrb.mxu2 %v693_v40 }
 0x1bc   : > { %v768_v51 = vsel %vm764_vm9, %v755_v5, %v763_v4  ;;  %v772_v32 = vsel %vm764_vm9, %v763_v4, %v755_v5  ;;  %2272 = vrot.lane.b32.xlu0 %v3661_v20, %s2985_s9 }
 0x1bd   : > { %1122 = vmatpush.msrb.mxu2 %v691_v36  ;;  %1142 = vmatpush.msrb.mxu3 %v692_v35  ;;  %v779_v60 = vmul.f32 %v768_v51, %v3108_v17  ;;  %v780_v1 = vmul.f32 %v772_v32, %v3110_v18  ;;  %v790_v58 = vpop.permute.xlu2 %789  ;;  %v3782_v51 = vld [vmem:[%s4731_s6] sm:$0xff] }
 0x1be   : > { %2812 = vmatmul.msk.f32.vlgmr.msrb.gmra.mxu2 %vm903_vm8, %v3411_v48  ;;  %2813 = vmatmul.msk.f32.vlgmr.msrb.gmra.mxu3 %vm903_vm8, %v3411_v48  ;;  %v1275_v32 = vperm.slane %v3782_v51, 2  ;;  %v1273_v34 = vperm.slane %v3782_v51, 0  ;;  %v1280_v27 = vperm.slane %v3782_v51, 7 }
 0x1bf   : > { %1159 = vmatpush.msra.mxu2 %v738_v54  ;;  %1179 = vmatpush.msra.mxu3 %v739_v39  ;;  %v3697_v36 = vpop.f32.mrf.mxu1 }
 0x1c0   : > { %2312 = vrot.lane.b32.xlu2 %v3626_v25, %s2986_s10  ;;  %2226 = vrot.lane.b32.xlu1 %v3697_v36, %s2984_s30 }
 0x1c1   : > { %1160 = vmatpush.msra.mxu2 %v736_v55  ;;  %1180 = vmatpush.msra.mxu3 %v737_v38 }
 0x1c2   : > { %v794_v49 = vpop.permute.xlu1 %793 }
 0x1c3   : > { %1161 = vmatpush.msra.mxu2 %v734_v44  ;;  %1181 = vmatpush.msra.mxu3 %v735_v53  ;;  %v792_v56 = vpop.permute.xlu0 %791  ;;  %v808_v22 = vsel %vm805_vm10, %v794_v49, %v802_v52  ;;  %v812_v42 = vsel %vm805_vm10, %v802_v52, %v794_v49 }
 0x1c4   : > { %v818_v40 = vmul.f32 %v808_v22, %v3104_v15 }
 0x1c5   : > { %1162 = vmatpush.msra.mxu2 %v732_v33  ;;  %1182 = vmatpush.msra.mxu3 %v733_v10  ;;  %v1277_v33 = vperm.slane %v3782_v51, 4  ;;  %v1276_v10 = vperm.slane %v3782_v51, 3 }
 0x1c6   : > { %2814 = vmatmul.msk.f32.vlgmr.msra.gmra.mxu2 %vm903_vm8, %v3411_v48  ;;  %2815 = vmatmul.msk.f32.vlgmr.msra.gmra.mxu3 %vm903_vm8, %v3411_v48 }
 0x1c7   : > { %1199 = vmatpush.msrb.mxu2 %v779_v60  ;;  %1219 = vmatpush.msrb.mxu3 %v780_v1  ;;  %v1274_v60 = vperm.slane %v3782_v51, 1  ;;  %v1278_v1 = vperm.slane %v3782_v51, 5 }
 0x1c9   : > { %1200 = vmatpush.msrb.mxu2 %v777_v28  ;;  %1220 = vmatpush.msrb.mxu3 %v778_v50  ;;  %v1281_v28 = vperm.slane %v3797_v62, 0 }
 0x1ca   : > { %v800_v29 = vpop.permute.xlu1 %799 }
 0x1cb   : > { %1201 = vmatpush.msrb.mxu2 %v775_v59  ;;  %1221 = vmatpush.msrb.mxu3 %v776_v57  ;;  %v804_v24 = vpop.permute.xlu0 %803  ;;  %v807_v37 = vsel %vm805_vm10, %v792_v56, %v800_v29  ;;  %v811_v45 = vsel %vm805_vm10, %v800_v29, %v792_v56  ;;  %v1279_v56 = vperm.slane %v3782_v51, 6 }
 0x1cc   : > { %v809_v61 = vsel %vm805_vm10, %v796_v2, %v804_v24  ;;  %v813_v21 = vsel %vm805_vm10, %v804_v24, %v796_v2  ;;  %v817_v41 = vmul.f32 %v811_v45, %v3102_v14  ;;  %v3687_v14 = vpop.f32.mrf.mxu0 }
 0x1cd   : > { %1222 = vmatpush.msrb.mxu3 %v774_v43  ;;  %v820_v19 = vmul.f32 %v809_v61, %v3108_v17  ;;  %v821_v30 = vmul.f32 %v813_v21, %v3110_v18  ;;  %1202 = vmatpush.msrb.mxu2 %v773_v23  ;;  %v819_v17 = vmul.f32 %v812_v42, %v3106_v16  ;;  %v1282_v23 = vperm.slane %v3797_v62, 1 }
 0x1ce   : > { %2816 = vmatmul.msk.f32.vlgmr.msrb.gmra.mxu2 %vm903_vm8, %v3411_v48  ;;  %2817 = vmatmul.msk.f32.vlgmr.msrb.gmra.mxu3 %vm903_vm8, %v3411_v48  ;;  %v816_v18 = vmul.f32 %v807_v37, %v3100_v13  ;;  %v1285_v61 = vperm.slane %v3797_v62, 4  ;;  %v1284_v42 = vperm.slane %v3797_v62, 3 }
 0x1cf   : > { %1239 = vmatpush.msra.mxu2 %v820_v19  ;;  %1259 = vmatpush.msra.mxu3 %v821_v30 }
 0x1d0   : > { %2218 = vrot.lane.b32.xlu0 %v3687_v14, %s2984_s30  ;;  %2266 = vrot.lane.b32.xlu2 %v3687_v14, %s2985_s9 }
 0x1d1   : > { %1240 = vmatpush.msra.mxu2 %v818_v40  ;;  %1260 = vmatpush.msra.mxu3 %v819_v17  ;;  %v1287_v40 = vperm.slane %v3797_v62, 6 }
 0x1d2   : > { %2314 = vrot.lane.b32.xlu1 %v3687_v14, %s2986_s10 }
 0x1d3   : > { %v798_v0 = vpop.permute.xlu0 %797  ;;  %1261 = vmatpush.msra.mxu3 %v817_v41  ;;  %1241 = vmatpush.msra.mxu2 %v816_v18  ;;  %v1286_v41 = vperm.slane %v3797_v62, 5 }
 0x1d4   : > { %v806_v15 = vsel %vm805_vm10, %v790_v58, %v798_v0  ;;  %v810_v16 = vsel %vm805_vm10, %v798_v0, %v790_v58  ;;  %v1269_v58 = vld [vmem:[%s4731_s6 + $0x10] sm:$0x3] }
 0x1d5   : > { %v814_v4 = vmul.f32 %v806_v15, %v3096_v11  ;;  %v815_v13 = vmul.f32 %v810_v16, %v3098_v12  ;;  %v3705_v11 = vpop.f32.mrf.mxu1  ;;  %v3711_v12 = vpop.f32.mrf.mxu0 }
 0x1d7   : > { %1242 = vmatpush.msra.mxu2 %v814_v4  ;;  %1262 = vmatpush.msra.mxu3 %v815_v13  ;;  %v1288_v13 = vperm.slane %v3797_v62, 7 }
 0x1d8   : > { %2818 = vmatmul.msk.f32.vlgmr.msra.gmra.mxu2 %vm903_vm8, %v3411_v48  ;;  %2819 = vmatmul.msk.f32.vlgmr.msra.gmra.mxu3 %vm903_vm8, %v3411_v48 }
 0x1d9   : > { %2274 = vrot.lane.b32.xlu0 %v3697_v36, %s2985_s9  ;;  %2322 = vrot.lane.b32.xlu2 %v3697_v36, %s2986_s10 }
 0x1da   : > { %2268 = vrot.lane.b32.xlu1 %v3711_v12, %s2985_s9 }
 0x1e1   : > { %2228 = vrot.lane.b32.xlu0 %v3705_v11, %s2984_s30  ;;  %2220 = vrot.lane.b32.xlu2 %v3711_v12, %s2984_s30 }
 0x1e2   : > { %2316 = vrot.lane.b32.xlu1 %v3711_v12, %s2986_s10 }
 0x1e9   : > { %2364 = vrot.lane.b32.xlu0 %v3711_v12, %s2987_s11  ;;  %2276 = vrot.lane.b32.xlu2 %v3705_v11, %s2985_s9 }
 0x1ea   : > { %2372 = vrot.lane.b32.xlu1 %v3705_v11, %s2987_s11 }
 0x1f1   : > { %2320 = vrot.lane.b32.xlu0 %v3661_v20, %s2986_s10  ;;  %2324 = vrot.lane.b32.xlu2 %v3705_v11, %s2986_s10 }
 0x1f2   : > { %2362 = vrot.lane.b32.xlu1 %v3687_v14, %s2987_s11 }
 0x1f9   : > { %2310 = vrot.lane.b32.xlu0 %v3575_v26, %s2986_s10  ;;  %2370 = vrot.lane.b32.xlu2 %v3697_v36, %s2987_s11 }
 0x1fa   : > { %2318 = vrot.lane.b32.xlu1 %v3598_v9, %s2986_s10 }
 0x201   : > { %2368 = vrot.lane.b32.xlu0 %v3661_v20, %s2987_s11  ;;  %2360 = vrot.lane.b32.xlu2 %v3626_v25, %s2987_s11 }
 0x202   : > { %2436 = vrot.lane.b32.xlu1 %v3711_v12, %s2988_s12 }
 0x209   : > { %2358 = vrot.lane.b32.xlu0 %v3575_v26, %s2987_s11  ;;  %2444 = vrot.lane.b32.xlu2 %v3705_v11, %s2988_s12 }
 0x20a   : > { %2366 = vrot.lane.b32.xlu1 %v3598_v9, %s2987_s11 }
 0x211   : > { %2442 = vrot.lane.b32.xlu0 %v3697_v36, %s2988_s12  ;;  %2434 = vrot.lane.b32.xlu2 %v3687_v14, %s2988_s12 }
 0x212   : > { %2484 = vrot.lane.b32.xlu1 %v3711_v12, %s2989_s13 }
 0x219   : > { %v924_v48 = vpop.f32.mrf.mxu2  ;;  %v944_v35 = vpop.f32.mrf.mxu3  ;;  %2432 = vrot.lane.b32.xlu0 %v3626_v25, %s2988_s12  ;;  %2492 = vrot.lane.b32.xlu2 %v3705_v11, %s2989_s13 }
 0x21a   : > { %2440 = vrot.lane.b32.xlu1 %v3661_v20, %s2988_s12  ;;  %v1309_v46 = vmul.f32 %v1273_v34, %v924_v48  ;;  %v3828_v2 = vmul.f32 %v1274_v60, %v944_v35 }
 0x221   : > { %v964_v5 = vpop.f32.mrf.mxu2  ;;  %v984_v6 = vpop.f32.mrf.mxu3  ;;  %2490 = vrot.lane.b32.xlu0 %v3697_v36, %s2989_s13  ;;  %2482 = vrot.lane.b32.xlu2 %v3687_v14, %s2989_s13 }
 0x222   : > { %2532 = vrot.lane.b32.xlu1 %v3711_v12, %s2990_s14  ;;  %v3801_v63 = vmul.f32 %v1275_v32, %v964_v5  ;;  %v3815_v50 = vmul.f32 %v1276_v10, %v984_v6  ;;  %v1289_v5 = vperm.slane %v1269_v58, 0 }
 0x224   : > { %v1327_v59 = vmax.f32 %v1309_v46, %v3801_v63  ;;  %v1328_v21 = vmax.f32 %v3828_v2, %v3815_v50 }
 0x229   : > { %v1004_v8 = vpop.f32.mrf.mxu2  ;;  %v1024_v54 = vpop.f32.mrf.mxu3  ;;  %2430 = vrot.lane.b32.xlu0 %v3575_v26, %s2988_s12  ;;  %2540 = vrot.lane.b32.xlu2 %v3705_v11, %s2990_s14 }
 0x22a   : > { %2438 = vrot.lane.b32.xlu1 %v3598_v9, %s2988_s12  ;;  %v3810_v47 = vmul.f32 %v1277_v33, %v1004_v8  ;;  %v3832_v43 = vmul.f32 %v1278_v1, %v1024_v54  ;;  %v1290_v54 = vperm.slane %v1269_v58, 1 }
 0x22c   : > { %v1329_v24 = vmax.f32 %v1327_v59, %v3810_v47  ;;  %v1330_v17 = vmax.f32 %v1328_v21, %v3832_v43 }
 0x231   : > { %v1044_v39 = vpop.f32.mrf.mxu2  ;;  %v1064_v55 = vpop.f32.mrf.mxu3  ;;  %2488 = vrot.lane.b32.xlu0 %v3661_v20, %s2989_s13  ;;  %2480 = vrot.lane.b32.xlu2 %v3626_v25, %s2989_s13 }
 0x232   : > { %2530 = vrot.lane.b32.xlu1 %v3687_v14, %s2990_s14  ;;  %v1315_v57 = vmul.f32 %v1279_v56, %v1044_v39  ;;  %v3845_v22 = vmul.f32 %v1280_v27, %v1064_v55 }
 0x234   : > { %v1331_v37 = vmax.f32 %v1329_v24, %v1315_v57  ;;  %v1332_v16 = vmax.f32 %v1330_v17, %v3845_v22 }
 0x239   : > { %v1084_v38 = vpop.f32.mrf.mxu2  ;;  %v1104_v52 = vpop.f32.mrf.mxu3  ;;  %2580 = vrot.lane.b32.xlu0 %v3711_v12, %s2991_s19  ;;  %2538 = vrot.lane.b32.xlu2 %v3697_v36, %s2990_s14 }
 0x23a   : > { %2588 = vrot.lane.b32.xlu1 %v3705_v11, %s2991_s19  ;;  %v1317_v29 = vmul.f32 %v1281_v28, %v1084_v38  ;;  %v3854_v18 = vmul.f32 %v1282_v23, %v1104_v52 }
 0x23c   : > { %v1333_v0 = vmax.f32 %v1331_v37, %v1317_v29  ;;  %v1334_v6 = vmax.f32 %v1332_v16, %v3854_v18 }
 0x241   : > { %v1124_v44 = vpop.f32.mrf.mxu2  ;;  %v1144_v53 = vpop.f32.mrf.mxu3  ;;  %2486 = vrot.lane.b32.xlu0 %v3598_v9, %s2989_s13  ;;  %2478 = vrot.lane.b32.xlu2 %v3575_v26, %s2989_s13 }
 0x242   : > { %v1319_v45 = vmul.f32 %v1283_v3, %v1124_v44  ;;  %v3865_v4 = vmul.f32 %v1284_v42, %v1144_v53  ;;  %2528 = vrot.lane.b32.xlu1 %v3626_v25, %s2990_s14 }
 0x244   : > { %v1335_v48 = vmax.f32 %v1333_v0, %v1319_v45  ;;  %v1336_v55 = vmax.f32 %v1334_v6, %v3865_v4 }
 0x249   : > { %v1164_v49 = vpop.f32.mrf.mxu2  ;;  %v1184_v7 = vpop.f32.mrf.mxu3  ;;  %2578 = vrot.lane.b32.xlu0 %v3687_v14, %s2991_s19  ;;  %2536 = vrot.lane.b32.xlu2 %v3661_v20, %s2990_s14 }
 0x24a   : > { %v1321_v15 = vmul.f32 %v1285_v61, %v1164_v49  ;;  %v3877_v8 = vmul.f32 %v1286_v41, %v1184_v7  ;;  %2586 = vrot.lane.b32.xlu1 %v3697_v36, %s2991_s19 }
 0x24c   : > { %v1337_v39 = vmax.f32 %v1335_v48, %v1321_v15  ;;  %v1338_v59 = vmax.f32 %v1336_v55, %v3877_v8 }
 0x251   : > { %v1204_v19 = vpop.f32.mrf.mxu2  ;;  %v1224_v30 = vpop.f32.mrf.mxu3  ;;  %2534 = vrot.lane.b32.xlu0 %v3598_v9, %s2990_s14  ;;  %2526 = vrot.lane.b32.xlu2 %v3575_v26, %s2990_s14  ;;  %s313_s14 = scalar_lea.vmem %s4732_s7, %s2914_s29 }
 0x252   : > { %v1323_v35 = vmul.f32 %v1287_v40, %v1204_v19  ;;  %v3884_v38 = vmul.f32 %v1288_v13, %v1224_v30  ;;  %2576 = vrot.lane.b32.xlu1 %v3626_v25, %s2991_s19 }
 0x254   : > { %v1339_v53 = vmax.f32 %v1337_v39, %v1323_v35  ;;  %v1340_v21 = vmax.f32 %v1338_v59, %v3884_v38 }
 0x259   : > { %2574 = vrot.lane.b32.xlu0 %v3575_v26, %s2991_s19  ;;  %2584 = vrot.lane.b32.xlu2 %v3661_v20, %s2991_s19 }
 0x25a   : > { %2582 = vrot.lane.b32.xlu1 %v3598_v9, %s2991_s19 }
 0x25b   : > { %v1244_v52 = vpop.f32.mrf.mxu2  ;;  %v1264_v44 = vpop.f32.mrf.mxu3 }
 0x25c   : > { %v1325_v49 = vmul.f32 %v1289_v5, %v1244_v52  ;;  %v3887_v24 = vmul.f32 %v1290_v54, %v1264_v44 }
 0x25e   : > { %v1341_v7 = vmax.f32 %v1339_v53, %v1325_v49  ;;  %v3897_v58 = vmax.f32 %v1340_v21, %v3887_v24 }
 0x260   : > { %v1343_v19 = vsub.f32 %v1309_v46, %v1341_v7  ;;  %v1349_v30 = vsub.f32 %v3801_v63, %v1341_v7  ;;  %v1355_v37 = vsub.f32 %v3810_v47, %v1341_v7  ;;  %v1361_v17 = vsub.f32 %v1315_v57, %v1341_v7 }
 0x261   : > { %v1367_v5 = vsub.f32 %v1317_v29, %v1341_v7  ;;  %v1373_v6 = vsub.f32 %v1319_v45, %v1341_v7  ;;  %v1344_v63 = vsub.f32 %v3828_v2, %v3897_v58  ;;  %v1350_v46 = vsub.f32 %v3815_v50, %v3897_v58 }
 0x262   : > { %v1345_v0 = vmul.f32 1.442695, %v1343_v19  ;;  %v1351_v16 = vmul.f32 1.442695, %v1349_v30  ;;  %v1357_v48 = vmul.f32 1.442695, %v1355_v37  ;;  %v1379_v57 = vsub.f32 %v1321_v15, %v1341_v7 }
 0x263   : > { %v1363_v54 = vmul.f32 1.442695, %v1361_v17  ;;  %v1369_v47 = vmul.f32 1.442695, %v1367_v5  ;;  %v1375_v29 = vmul.f32 1.442695, %v1373_v6  ;;  %v1356_v45 = vsub.f32 %v3832_v43, %v3897_v58 }
 0x264   : > { %2936 = vpow2.f32 %v1345_v0  ;;  %v1385_v39 = vsub.f32 %v1323_v35, %v1341_v7  ;;  %v1347_v55 = vmul.f32 1.442695, %v1344_v63  ;;  %v1353_v52 = vmul.f32 1.442695, %v1350_v46 }
 0x265   : > { %2938 = vpow2.f32 %v1351_v16  ;;  %v1362_v50 = vsub.f32 %v3845_v22, %v3897_v58  ;;  %v1381_v44 = vmul.f32 1.442695, %v1379_v57  ;;  %v1391_v53 = vsub.f32 %v1325_v49, %v1341_v7 }
 0x266   : > { %2940 = vpow2.f32 %v1357_v48  ;;  %v1359_v21 = vmul.f32 1.442695, %v1356_v45  ;;  %v1368_v43 = vsub.f32 %v3854_v18, %v3897_v58  ;;  %v1387_v19 = vmul.f32 1.442695, %v1385_v39 }
 0x267   : > { %2942 = vpow2.f32 %v1363_v54  ;;  %v1365_v37 = vmul.f32 1.442695, %v1362_v50  ;;  %v1374_v22 = vsub.f32 %v3865_v4, %v3897_v58  ;;  %v1393_v49 = vmul.f32 1.442695, %v1391_v53 }
 0x268   : > { %2944 = vpow2.f32 %v1369_v47  ;;  %v1371_v0 = vmul.f32 1.442695, %v1368_v43  ;;  %v1380_v18 = vsub.f32 %v3877_v8, %v3897_v58  ;;  %v1386_v4 = vsub.f32 %v3884_v38, %v3897_v58 }
 0x269   : > { %2946 = vpow2.f32 %v1375_v29  ;;  %v1377_v6 = vmul.f32 1.442695, %v1374_v22  ;;  %v1392_v63 = vsub.f32 %v3887_v24, %v3897_v58 }
 0x26a   : > { %v3911_v2 = vpop.eup %2936  ;;  %2948 = vpow2.f32 %v1347_v55  ;;  %v1383_v8 = vmul.f32 1.442695, %v1380_v18  ;;  %v1389_v39 = vmul.f32 1.442695, %v1386_v4 }
 0x26b   : > { %v3915_v15 = vpop.eup %2938  ;;  %2950 = vpow2.f32 %v1353_v52  ;;  %v1395_v52 = vmul.f32 1.442695, %v1392_v63 }
 0x26c   : > { %v1397_v59 = vadd.f32 %v3915_v15, %v3911_v2  ;;  %v2941_v35 = vpop.eup %2940  ;;  %2952 = vpow2.f32 %v1381_v44 }
 0x26d   : > { %v2943_v17 = vpop.eup %2942  ;;  %2954 = vpow2.f32 %v1359_v21 }
 0x26e   : > { %v1399_v30 = vadd.f32 %v2941_v35, %v1397_v59  ;;  %v2945_v16 = vpop.eup %2944  ;;  %2956 = vpow2.f32 %v1387_v19 }
 0x26f   : > { %v2947_v48 = vpop.eup %2946  ;;  %2958 = vpow2.f32 %v1365_v37 }
 0x270   : > { %v1401_v7 = vadd.f32 %v2943_v17, %v1399_v30  ;;  %v3929_v54 = vpop.eup %2948  ;;  %2960 = vpow2.f32 %v1393_v49 }
 0x271   : > { %v3933_v46 = vpop.eup %2950  ;;  %2962 = vpow2.f32 %v1371_v0 }
 0x272   : > { %v1403_v5 = vadd.f32 %v2945_v16, %v1401_v7  ;;  %v3935_v57 = vpop.eup %2952  ;;  %v1398_v29 = vadd.f32 %v3933_v46, %v3929_v54  ;;  %2964 = vpow2.f32 %v1377_v6 }
 0x273   : > { %v3939_v45 = vpop.eup %2954  ;;  %2966 = vpow2.f32 %v1383_v8 }
 0x274   : > { %v1405_v47 = vadd.f32 %v2947_v48, %v1403_v5  ;;  %v2957_v55 = vpop.eup %2956  ;;  %v1400_v24 = vadd.f32 %v3939_v45, %v1398_v29  ;;  %2968 = vpow2.f32 %v1389_v39 }
 0x275   : > { %v2959_v58 = vpop.eup %2958  ;;  %2970 = vpow2.f32 %v1395_v52 }
 0x276   : > { %v1407_v38 = vadd.f32 %v3935_v57, %v1405_v47  ;;  %v2961_v44 = vpop.eup %2960  ;;  %v1402_v53 = vadd.f32 %v2959_v58, %v1400_v24 }
 0x277   : > { %v2963_v59 = vpop.eup %2962 }
 0x278   : > { %v1409_v50 = vadd.f32 %v2957_v55, %v1407_v38  ;;  %v1404_v43 = vadd.f32 %v2963_v59, %v1402_v53  ;;  %v2965_v19 = vpop.eup %2964 }
 0x279   : > { %v2967_v37 = vpop.eup %2966 }
 0x27a   : > { %v1411_v21 = vadd.f32 %v2961_v44, %v1409_v50  ;;  %v1406_v30 = vadd.f32 %v2965_v19, %v1404_v43  ;;  %v3943_v49 = vpop.eup %2968 }
 0x27b   : > { %v2971_v7 = vpop.eup %2970 }
 0x27c   : > { %2972 = vrcp.f32 %v1411_v21  ;;  %v1408_v22 = vadd.f32 %v2967_v37, %v1406_v30 }
 0x27e   : > { %v1410_v0 = vadd.f32 %v3943_v49, %v1408_v22 }
 0x280   : > { %v1412_v5 = vadd.f32 %v2971_v7, %v1410_v0 }
 0x282   : > { %v3946_v18 = vpop.eup %2972  ;;  %2974 = vrcp.f32 %v1412_v5 }
 0x283   : > { %v1415_v6 = vmul.f32 %v3946_v18, %v3911_v2  ;;  %v1417_v4 = vmul.f32 %v3946_v18, %v3915_v15  ;;  %v1419_v63 = vmul.f32 %v3946_v18, %v2941_v35  ;;  %v1421_v47 = vmul.f32 %v3946_v18, %v2943_v17  ;;  %v3967_v15 = vld [vmem:[%s4730_s5] sm:$0xff] }
 0x284   : > { %v3955_v8 = vmul.f32 %v3946_v18, %v2945_v16  ;;  %v3958_v29 = vmul.f32 %v3946_v18, %v2947_v48  ;;  %v3993_v16 = vpop.permute.xlu2 %2222  ;;  %v3999_v52 = vmul.f32 %v3946_v18, %v2957_v55 }
 0x285   : > { %v1535_v38 = vmul.f32 %v1415_v6, %v1273_v34  ;;  %v1537_v2 = vmul.f32 %v1417_v4, %v1275_v32  ;;  %v1539_v35 = vmul.f32 %v1419_v63, %v1277_v33  ;;  %v1541_v17 = vmul.f32 %v1421_v47, %v1279_v56 }
 0x286   : > { %v1543_v32 = vmul.f32 %v3955_v8, %v1281_v28  ;;  %v1545_v34 = vmul.f32 %v3958_v29, %v1283_v3  ;;  %v3988_v33 = vmul.f32 %v3946_v18, %v2961_v44  ;;  %v3995_v28 = vpop.permute.xlu0 %2262  ;;  %v1452_v48 = vrot.slane %v1417_v4, 4 }
 0x287   : > { %2820 = vmatpush.msk.msrb.mxu2 %vm1464_vm11, %v1535_v38  ;;  %2830 = vmatpush.msk.msrb.mxu0 %vm1464_vm11, %v1537_v2  ;;  %v1455_v3 = vrot.slane %v1421_v47, 4  ;;  %v1458_v39 = vrot.slane %v3958_v29, 4  ;;  %v1427_v38 = vmul.f32 %v3946_v18, %v3935_v57 }
 0x288   : > { %2821 = vmatmul.msk.f32.vlgmr.msrb.gmra.mxu2 %vm1553_vm12, %v3967_v15  ;;  %2831 = vmatmul.msk.f32.vlgmr.msrb.gmra.mxu0 %vm1553_vm12, %v3967_v15  ;;  %v2975_v56 = vpop.eup %2974 }
 0x289   : > { %2840 = vmatpush.msk.msra.mxu2 %vm1464_vm11, %v1539_v35  ;;  %2850 = vmatpush.msk.msra.mxu0 %vm1464_vm11, %v1541_v17  ;;  %v4001_v24 = vmul.f32 %v2975_v56, %v2971_v7  ;;  %v1416_v50 = vmul.f32 %v2975_v56, %v3929_v54  ;;  %v1418_v44 = vmul.f32 %v2975_v56, %v3933_v46 }
 0x28a   : > { %v1420_v53 = vmul.f32 %v2975_v56, %v3939_v45  ;;  %v1422_v21 = vmul.f32 %v2975_v56, %v2959_v58  ;;  %v1424_v43 = vmul.f32 %v2975_v56, %v2963_v59  ;;  %v1426_v30 = vmul.f32 %v2975_v56, %v2965_v19 }
 0x28b   : > { %2860 = vmatpush.msk.msrb.mxu2 %vm1464_vm11, %v1543_v32  ;;  %2870 = vmatpush.msk.msrb.mxu0 %vm1464_vm11, %v1545_v34  ;;  %v4006_v22 = vmul.f32 %v2975_v56, %v2967_v37  ;;  %v1463_v55 = vrot.slane %v4001_v24, 6  ;;  %v1451_v7 = vrot.slane %v1416_v50, 6  ;;  %v1536_v54 = vmul.f32 %v1416_v50, %v1274_v60  ;;  %v4094_v50 = vld [vmem:[%s4730_s5 + $0x18] sm:$0xff] }
 0x28c   : > { %v1453_v46 = vrot.slane %v1418_v44, 2  ;;  %v1538_v45 = vmul.f32 %v1418_v44, %v1276_v10  ;;  %v1454_v58 = vrot.slane %v1420_v53, 6  ;;  %v1540_v59 = vmul.f32 %v1420_v53, %v1278_v1  ;;  %v4030_v10 = vld [vmem:[%s4730_s5 + $0x8] sm:$0xff]  ;;  %v4065_v57 = vpop.permute.xlu2 %2264 }
 0x28d   : > { %v1456_v19 = vrot.slane %v1422_v21, 2  ;;  %v1478_v37 = vsel %vm1464_vm11, %v3988_v33, %v1463_v55  ;;  %2825 = vmatpush.msk.msrb.mxu3 %vm1464_vm11, %v1536_v54  ;;  %v1465_v0 = vsel %vm1464_vm11, %v1415_v6, %v1451_v7  ;;  %v1542_v60 = vmul.f32 %v1422_v21, %v1280_v27 }
 0x28e   : > { %v1467_v5 = vsel %vm1466_vm13, %v1452_v48, %v1453_v46  ;;  %1488 = vst [vmem:[%s4011_s18 + $0x20] sm:$0xf] %v1478_v37  ;;  %2835 = vmatpush.msk.msrb.mxu1 %vm1464_vm11, %v1538_v45  ;;  %2826 = vmatmul.msk.f32.vlgmr.msrb.gmra.mxu3 %vm1553_vm12, %v3967_v15  ;;  %v1469_v6 = vsel %vm1464_vm11, %v1419_v63, %v1454_v58  ;;  %v1457_v27 = vrot.slane %v1424_v43, 6  ;;  %v1459_v29 = vrot.slane %v1426_v30, 2  ;;  %v4067_v18 = vpop.permute.xlu0 %2216  ;;  %v4074_v48 = vld [vmem:[%s4730_s5 + $0x10] sm:$0xff] }
 0x28f   : > { %v1468_v1 = vsel %vm373_vm0, %v1465_v0, %v1467_v5  ;;  %v1470_v4 = vsel %vm1466_vm13, %v1455_v3, %v1456_v19  ;;  %2836 = vmatmul.msk.f32.vlgmr.msrb.gmra.mxu1 %vm1553_vm12, %v3967_v15  ;;  %2845 = vmatpush.msk.msra.mxu3 %vm1464_vm11, %v1540_v59  ;;  %v1544_v47 = vmul.f32 %v1424_v43, %v1282_v23  ;;  %v1460_v2 = vrot.slane %v4006_v22, 6 }
 0x290   : > { %1484 = vst [vmem:[%s4011_s18] sm:$0xff] %v1468_v1  ;;  %v1471_v51 = vsel %vm373_vm0, %v1469_v6, %v1470_v4  ;;  %2855 = vmatpush.msk.msra.mxu1 %vm1464_vm11, %v1542_v60  ;;  %v1546_v63 = vmul.f32 %v1426_v30, %v1284_v42  ;;  %2822 = vmatmul.msk.f32.gmra.mxu2 %vm1553_vm12, %v4030_v10  ;;  %v1461_v42 = vrot.slane %v3999_v52, 4 }
 0x291   : > { %1485 = vst [vmem:[%s4011_s18 + $0x8] sm:$0xff] %v1471_v51  ;;  %v1472_v35 = vsel %vm1464_vm11, %v3955_v8, %v1457_v27  ;;  %2865 = vmatpush.msk.msrb.mxu3 %vm1464_vm11, %v1544_v47  ;;  %v1473_v23 = vsel %vm1466_vm13, %v1458_v39, %v1459_v29  ;;  %2832 = vmatmul.msk.f32.gmra.mxu0 %vm1553_vm12, %v4030_v10 }
 0x292   : > { %v1430_v17 = vmul.f32 %v2975_v56, %v3943_v49  ;;  %v1474_v32 = vsel %vm373_vm0, %v1472_v35, %v1473_v23  ;;  %2875 = vmatpush.msk.msrb.mxu1 %vm1464_vm11, %v1546_v63  ;;  %v1475_v8 = vsel %vm1464_vm11, %v1427_v38, %v1460_v2  ;;  %v1547_v21 = vmul.f32 %v1427_v38, %v1285_v61 }
 0x293   : > { %1486 = vst [vmem:[%s4011_s18 + $0x10] sm:$0xff] %v1474_v32  ;;  %v1549_v43 = vmul.f32 %v3999_v52, %v1287_v40  ;;  %v1548_v30 = vmul.f32 %v4006_v22, %v1286_v41  ;;  %v1495_v22 = vld [vmem:[%s4731_s6 + $0x10] sm:$0x3] }
 0x294   : > { %v1462_v34 = vrot.slane %v1430_v17, 2  ;;  %v4087_v56 = vpop.permute.xlu2 %2312  ;;  %v1550_v61 = vmul.f32 %v1430_v17, %v1288_v13  ;;  %v4154_v13 = vpop.permute.xlu1 %2214  ;;  %v1515_v55 = vperm.slane %v1495_v22, 0  ;;  %v1516_v58 = vperm.slane %v1495_v22, 1 }
 0x295   : > { %v2234_v17 = vsel %vm502_vm2, %v3993_v16, %v4154_v13 }
 0x296   : > { %v1476_v3 = vsel %vm1466_vm13, %v1461_v42, %v1462_v34  ;;  %2827 = vmatmul.msk.f32.gmra.mxu3 %vm1553_vm12, %v4030_v10  ;;  %v4089_v39 = vpop.permute.xlu0 %2272  ;;  %v1551_v46 = vmul.f32 %v1515_v55, %v3988_v33  ;;  %v1552_v59 = vmul.f32 %v1516_v58, %v4001_v24 }
 0x297   : > { %v1477_v49 = vsel %vm373_vm0, %v1475_v8, %v1476_v3  ;;  %2837 = vmatmul.msk.f32.gmra.mxu1 %vm1553_vm12, %v4030_v10 }
 0x298   : > { %1487 = vst [vmem:[%s4011_s18 + $0x18] sm:$0xff] %v1477_v49  ;;  %2823 = vmatmul.msk.f32.gmra.mxu2 %vm1553_vm12, %v4074_v48 }
 0x299   : > { %2833 = vmatmul.msk.f32.gmra.mxu0 %vm1553_vm12, %v4074_v48 }
 0x29c   : > { %v4104_v44 = vpop.permute.xlu2 %2266  ;;  %v4176_v45 = vpop.permute.xlu1 %2270 }
 0x29d   : > { %v2282_v23 = vsel %vm543_vm4, %v4176_v45, %v3995_v28 }
 0x29e   : > { %2828 = vmatmul.msk.f32.gmra.mxu3 %vm1553_vm12, %v4074_v48  ;;  %v4106_v53 = vpop.permute.xlu0 %2218 }
 0x29f   : > { %2838 = vmatmul.msk.f32.gmra.mxu1 %vm1553_vm12, %v4074_v48 }
 0x2a0   : > { %2824 = vmatmul.msk.f32.gmra.mxu2 %vm1553_vm12, %v4094_v50 }
 0x2a1   : > { %2834 = vmatmul.msk.f32.gmra.mxu0 %vm1553_vm12, %v4094_v50 }
 0x2a4   : > { %v4133_v40 = vpop.permute.xlu2 %2322  ;;  %v4197_v33 = vpop.permute.xlu1 %2224 }
 0x2a5   : > { %v2235_v58 = vsel %vm502_vm2, %v4197_v33, %v4067_v18 }
 0x2a6   : > { %2829 = vmatmul.msk.f32.gmra.mxu3 %vm1553_vm12, %v4094_v50  ;;  %v4135_v52 = vpop.permute.xlu0 %2274 }
 0x2a7   : > { %2839 = vmatmul.msk.f32.gmra.mxu1 %vm1553_vm12, %v4094_v50 }
 0x2a8   : > { %2841 = vmatmul.msk.f32.vlgmr.msra.gmra.mxu2 %vm1553_vm12, %v3967_v15 }
 0x2a9   : > { %2851 = vmatmul.msk.f32.vlgmr.msra.gmra.mxu0 %vm1553_vm12, %v3967_v15  ;;  %2880 = vmatpush.msk.msra.mxu2 %vm1464_vm11, %v1547_v21 }
 0x2aa   : > { %2890 = vmatpush.msk.msra.mxu0 %vm1464_vm11, %v1549_v43  ;;  %v2278_v43 = vsel %vm543_vm4, %v3995_v28, %v4176_v45 }
 0x2ac   : > { %v4152_v41 = vpop.permute.xlu2 %2220  ;;  %v4211_v5 = vpop.permute.xlu1 %2226 }
 0x2ae   : > { %2846 = vmatmul.msk.f32.vlgmr.msra.gmra.mxu3 %vm1553_vm12, %v3967_v15  ;;  %v4150_v62 = vpop.permute.xlu0 %2228 }
 0x2af   : > { %2856 = vmatmul.msk.f32.vlgmr.msra.gmra.mxu1 %vm1553_vm12, %v3967_v15  ;;  %2885 = vmatpush.msk.msra.mxu3 %vm1464_vm11, %v1548_v30 }
 0x2b0   : > { %2895 = vmatpush.msk.msra.mxu1 %vm1464_vm11, %v1550_v61  ;;  %2842 = vmatmul.msk.f32.gmra.mxu2 %vm1553_vm12, %v4030_v10  ;;  %v2230_v61 = vsel %vm502_vm2, %v4154_v13, %v3993_v16 }
 0x2b1   : > { %2852 = vmatmul.msk.f32.gmra.mxu0 %vm1553_vm12, %v4030_v10 }
 0x2b4   : > { %v4169_v54 = vpop.permute.xlu2 %2276  ;;  %v4225_v6 = vpop.permute.xlu1 %2314 }
 0x2b6   : > { %2847 = vmatmul.msk.f32.gmra.mxu3 %vm1553_vm12, %v4030_v10  ;;  %v4167_v7 = vpop.permute.xlu0 %2364 }
 0x2b7   : > { %2857 = vmatmul.msk.f32.gmra.mxu1 %vm1553_vm12, %v4030_v10 }
 0x2b8   : > { %2843 = vmatmul.msk.f32.gmra.mxu2 %vm1553_vm12, %v4074_v48 }
 0x2b9   : > { %2853 = vmatmul.msk.f32.gmra.mxu0 %vm1553_vm12, %v4074_v48 }
 0x2bc   : > { %v4186_v37 = vpop.permute.xlu2 %2324  ;;  %v4243_v27 = vpop.permute.xlu1 %2268 }
 0x2be   : > { %2848 = vmatmul.msk.f32.gmra.mxu3 %vm1553_vm12, %v4074_v48  ;;  %v4184_v19 = vpop.permute.xlu0 %2320 }
 0x2bf   : > { %2858 = vmatmul.msk.f32.gmra.mxu1 %vm1553_vm12, %v4074_v48 }
 0x2c0   : > { %2844 = vmatmul.msk.f32.gmra.mxu2 %vm1553_vm12, %v4094_v50 }
 0x2c1   : > { %2854 = vmatmul.msk.f32.gmra.mxu0 %vm1553_vm12, %v4094_v50 }
 0x2c4   : > { %v4205_v0 = vpop.permute.xlu2 %2370  ;;  %v4267_v38 = vpop.permute.xlu1 %2316 }
 0x2c6   : > { %2849 = vmatmul.msk.f32.gmra.mxu3 %vm1553_vm12, %v4094_v50  ;;  %v4203_v24 = vpop.permute.xlu0 %2310 }
 0x2c7   : > { %2859 = vmatmul.msk.f32.gmra.mxu1 %vm1553_vm12, %v4094_v50 }
 0x2c8   : > { %2861 = vmatmul.msk.f32.vlgmr.msrb.gmra.mxu2 %vm1553_vm12, %v3967_v15 }
 0x2c9   : > { %2871 = vmatmul.msk.f32.vlgmr.msrb.gmra.mxu0 %vm1553_vm12, %v3967_v15  ;;  %2900 = vmatpush.msk.msrb.mxu2 %vm1464_vm11, %v1551_v46 }
 0x2cc   : > { %v4223_v1 = vpop.permute.xlu2 %2360  ;;  %v4277_v2 = vpop.permute.xlu1 %2372 }
 0x2ce   : > { %2866 = vmatmul.msk.f32.vlgmr.msrb.gmra.mxu3 %vm1553_vm12, %v3967_v15  ;;  %v4221_v60 = vpop.permute.xlu0 %2368 }
 0x2cf   : > { %2876 = vmatmul.msk.f32.vlgmr.msrb.gmra.mxu1 %vm1553_vm12, %v3967_v15  ;;  %2905 = vmatpush.msk.msrb.mxu3 %vm1464_vm11, %v1552_v59 }
 0x2d0   : > { %2862 = vmatmul.msk.f32.gmra.mxu2 %vm1553_vm12, %v4030_v10 }
 0x2d1   : > { %2872 = vmatmul.msk.f32.gmra.mxu0 %vm1553_vm12, %v4030_v10 }
 0x2d4   : > { %v4237_v51 = vpop.permute.xlu2 %2444  ;;  %v4295_v49 = vpop.permute.xlu1 %2362 }
 0x2d6   : > { %2867 = vmatmul.msk.f32.gmra.mxu3 %vm1553_vm12, %v4030_v10  ;;  %v4235_v4 = vpop.permute.xlu0 %2358 }
 0x2d7   : > { %2877 = vmatmul.msk.f32.gmra.mxu1 %vm1553_vm12, %v4030_v10 }
 0x2d8   : > { %2863 = vmatmul.msk.f32.gmra.mxu2 %vm1553_vm12, %v4074_v48 }
 0x2d9   : > { %2873 = vmatmul.msk.f32.gmra.mxu0 %vm1553_vm12, %v4074_v48 }
 0x2dc   : > { %v4251_v29 = vpop.permute.xlu2 %2434 }
 0x2de   : > { %2868 = vmatmul.msk.f32.gmra.mxu3 %vm1553_vm12, %v4074_v48  ;;  %v4249_v47 = vpop.permute.xlu0 %2442 }
 0x2df   : > { %2878 = vmatmul.msk.f32.gmra.mxu1 %vm1553_vm12, %v4074_v48  ;;  %v4261_v63 = vsel %vm682_vm7, %v4249_v47, %v4251_v29 }
 0x2e0   : > { %2864 = vmatmul.msk.f32.gmra.mxu2 %vm1553_vm12, %v4094_v50 }
 0x2e1   : > { %2874 = vmatmul.msk.f32.gmra.mxu0 %vm1553_vm12, %v4094_v50 }
 0x2e6   : > { %2869 = vmatmul.msk.f32.gmra.mxu3 %vm1553_vm12, %v4094_v50 }
 0x2e7   : > { %2879 = vmatmul.msk.f32.gmra.mxu1 %vm1553_vm12, %v4094_v50 }
 0x2e8   : > { %2881 = vmatmul.msk.f32.vlgmr.msra.gmra.mxu2 %vm1553_vm12, %v3967_v15 }
 0x2e9   : > { %2891 = vmatmul.msk.f32.vlgmr.msra.gmra.mxu0 %vm1553_vm12, %v3967_v15 }
 0x2ee   : > { %2886 = vmatmul.msk.f32.vlgmr.msra.gmra.mxu3 %vm1553_vm12, %v3967_v15 }
 0x2ef   : > { %2896 = vmatmul.msk.f32.vlgmr.msra.gmra.mxu1 %vm1553_vm12, %v3967_v15 }
 0x2f0   : > { %2882 = vmatmul.msk.f32.gmra.mxu2 %vm1553_vm12, %v4030_v10 }
 0x2f1   : > { %2892 = vmatmul.msk.f32.gmra.mxu0 %vm1553_vm12, %v4030_v10 }
 0x2f6   : > { %2887 = vmatmul.msk.f32.gmra.mxu3 %vm1553_vm12, %v4030_v10 }
 0x2f7   : > { %2897 = vmatmul.msk.f32.gmra.mxu1 %vm1553_vm12, %v4030_v10 }
 0x2f8   : > { %2883 = vmatmul.msk.f32.gmra.mxu2 %vm1553_vm12, %v4074_v48 }
 0x2f9   : > { %2893 = vmatmul.msk.f32.gmra.mxu0 %vm1553_vm12, %v4074_v48 }
 0x2fe   : > { %2888 = vmatmul.msk.f32.gmra.mxu3 %vm1553_vm12, %v4074_v48 }
 0x2ff   : > { %2898 = vmatmul.msk.f32.gmra.mxu1 %vm1553_vm12, %v4074_v48 }
 0x300   : > { %2884 = vmatmul.msk.f32.gmra.mxu2 %vm1553_vm12, %v4094_v50 }
 0x301   : > { %2894 = vmatmul.msk.f32.gmra.mxu0 %vm1553_vm12, %v4094_v50 }
 0x305   : > { %v1695_v35 = vpop.f32.mrf.mxu0 }
 0x306   : > { %2889 = vmatmul.msk.f32.gmra.mxu3 %vm1553_vm12, %v4094_v50  ;;  %v2294_v32 = vmul.f32 %v2282_v23, %v1695_v35  ;;  %v2319_v23 = vpop.permute.xlu1 %2318 }
 0x307   : > { %2899 = vmatmul.msk.f32.gmra.mxu1 %vm1553_vm12, %v4094_v50 }
 0x308   : > { %2901 = vmatmul.msk.f32.vlgmr.msrb.gmra.mxu2 %vm1553_vm12, %v3967_v15 }
 0x30b   : > { %v1637_v42 = vpop.f32.mrf.mxu2 }
 0x30c   : > { %v2246_v8 = vmul.f32 %v2234_v17, %v1637_v42  ;;  %v1724_v3 = vpop.f32.mrf.mxu1  ;;  %v2279_v42 = vsel %vm543_vm4, %v4065_v57, %v4089_v39 }
 0x30d   : > { %v2295_v22 = vmul.f32 %v2278_v43, %v1724_v3  ;;  %v2284_v3 = vsel %vm543_vm4, %v4135_v52, %v4104_v44  ;;  %v2236_v43 = vsel %vm502_vm2, %v4211_v5, %v4106_v53 }
 0x30e   : > { %v4293_v34 = vadd.f32 %v2294_v32, %v2246_v8  ;;  %2906 = vmatmul.msk.f32.vlgmr.msrb.gmra.mxu3 %vm1553_vm12, %v3967_v15  ;;  %v1698_v21 = vpop.f32.mrf.mxu0  ;;  %v2283_v15 = vsel %vm543_vm4, %v4089_v39, %v4065_v57  ;;  %v2231_v32 = vsel %vm502_vm2, %v4067_v18, %v4197_v33 }
 0x30f   : > { %v2296_v45 = vmul.f32 %v2283_v15, %v1698_v21  ;;  %v2232_v15 = vsel %vm502_vm2, %v4106_v53, %v4211_v5 }
 0x310   : > { %2902 = vmatmul.msk.f32.gmra.mxu2 %vm1553_vm12, %v4030_v10 }
 0x311   : > { %v1666_v30 = vpop.f32.mrf.mxu3 }
 0x312   : > { %v2247_v55 = vmul.f32 %v2230_v61, %v1666_v30 }
 0x313   : > { %v1640_v46 = vpop.f32.mrf.mxu2 }
 0x314   : > { %v4317_v28 = vadd.f32 %v2295_v22, %v2247_v55  ;;  %v1727_v59 = vpop.f32.mrf.mxu1  ;;  %v2248_v35 = vmul.f32 %v2235_v58, %v1640_v46  ;;  %v2280_v22 = vsel %vm543_vm4, %v4104_v44, %v4135_v52  ;;  %v4357_v46 = vpop.permute.xlu1 %2436  ;;  %v2237_v44 = vsel %vm502_vm2, %v4150_v62, %v4152_v41 }
 0x315   : > { %v2297_v8 = vmul.f32 %v2279_v42, %v1727_v59 }
 0x316   : > { %2907 = vmatmul.msk.f32.gmra.mxu3 %vm1553_vm12, %v4030_v10  ;;  %v4321_v16 = vadd.f32 %v2296_v45, %v2248_v35  ;;  %v1701_v13 = vpop.f32.mrf.mxu0  ;;  %v2285_v45 = vsel %vm543_vm4, %v4169_v54, %v4243_v27 }
 0x317   : > { %v2298_v39 = vmul.f32 %v2284_v3, %v1701_v13 }
 0x318   : > { %2903 = vmatmul.msk.f32.gmra.mxu2 %vm1553_vm12, %v4074_v48 }
 0x319   : > { %v1669_v17 = vpop.f32.mrf.mxu3 }
 0x31a   : > { %v2249_v10 = vmul.f32 %v2231_v32, %v1669_v17  ;;  %v2281_v17 = vsel %vm543_vm4, %v4243_v27, %v4169_v54 }
 0x31b   : > { %v1643_v21 = vpop.f32.mrf.mxu2 }
 0x31c   : > { %v4341_v57 = vadd.f32 %v2297_v8, %v2249_v10  ;;  %v1730_v30 = vpop.f32.mrf.mxu1  ;;  %v2250_v61 = vmul.f32 %v2236_v43, %v1643_v21  ;;  %v2233_v8 = vsel %vm502_vm2, %v4152_v41, %v4150_v62  ;;  %v2367_v43 = vpop.permute.xlu1 %2366 }
 0x31d   : > { %v2378_v54 = vsel %vm625_vm5, %v2367_v43, %v4235_v4 }
 0x31e   : > { %2908 = vmatmul.msk.f32.gmra.mxu3 %vm1553_vm12, %v4074_v48  ;;  %v4345_v18 = vadd.f32 %v2298_v39, %v2250_v61  ;;  %v1704_v33 = vpop.f32.mrf.mxu0  ;;  %v2299_v48 = vmul.f32 %v2280_v22, %v1730_v30 }
 0x31f   : > { %v2300_v35 = vmul.f32 %v2285_v45, %v1704_v33  ;;  %v2331_v45 = vsel %vm584_vm3, %v4184_v19, %v4087_v56 }
 0x320   : > { %2904 = vmatmul.msk.f32.gmra.mxu2 %vm1553_vm12, %v4094_v50 }
 0x321   : > { %v1672_v55 = vpop.f32.mrf.mxu3 }
 0x322   : > { %v2251_v58 = vmul.f32 %v2232_v15, %v1672_v55  ;;  %v2326_v55 = vsel %vm584_vm3, %v4203_v24, %v2319_v23 }
 0x323   : > { %v1646_v59 = vpop.f32.mrf.mxu2 }
 0x324   : > { %v4367_v52 = vadd.f32 %v2299_v48, %v2251_v58  ;;  %v1733_v13 = vpop.f32.mrf.mxu1  ;;  %v2252_v53 = vmul.f32 %v2237_v44, %v1646_v59  ;;  %v2374_v48 = vsel %vm625_vm5, %v4235_v4, %v2367_v43 }
 0x325   : > { %v2301_v10 = vmul.f32 %v2281_v17, %v1733_v13 }
 0x326   : > { %2909 = vmatmul.msk.f32.gmra.mxu3 %vm1553_vm12, %v4094_v50  ;;  %v2308_v5 = vadd.f32 %v2300_v35, %v2252_v53  ;;  %v1811_v42 = vpop.f32.mrf.mxu0  ;;  %v2330_v50 = vsel %vm584_vm3, %v2319_v23, %v4203_v24  ;;  %v2379_v24 = vsel %vm625_vm5, %v4221_v60, %v4223_v1 }
 0x327   : > { %v2390_v27 = vmul.f32 %v2378_v54, %v1811_v42 }
 0x329   : > { %v1675_v32 = vpop.f32.mrf.mxu3 }
 0x32a   : > { %v2253_v3 = vmul.f32 %v2233_v8, %v1675_v32  ;;  %v2327_v32 = vsel %vm584_vm3, %v4087_v56, %v4184_v19  ;;  %v2375_v8 = vsel %vm625_vm5, %v4223_v1, %v4221_v60  ;;  %v2380_v56 = vsel %vm625_vm5, %v4205_v0, %v4295_v49 }
 0x32b   : > { %v1753_v21 = vpop.f32.mrf.mxu2 }
 0x32c   : > { %v2309_v39 = vadd.f32 %v2301_v10, %v2253_v3  ;;  %v1840_v30 = vpop.f32.mrf.mxu1  ;;  %v2342_v61 = vmul.f32 %v2330_v50, %v1753_v21 }
 0x32d   : > { %v2391_v59 = vmul.f32 %v2374_v48, %v1840_v30 }
 0x32e   : > { %v2350_v33 = vadd.f32 %v2342_v61, %v4293_v34  ;;  %v1814_v22 = vpop.f32.mrf.mxu0 }
 0x32f   : > { %v2392_v23 = vmul.f32 %v2379_v24, %v1814_v22  ;;  %v2376_v22 = vsel %vm625_vm5, %v4295_v49, %v4205_v0  ;;  %v2329_v0 = vsel %vm584_vm3, %v4267_v38, %v4186_v37  ;;  %v4447_v49 = vpop.permute.xlu2 %2492 }
 0x330   : > { %v2398_v62 = vadd.f32 %v2390_v27, %v2350_v33  ;;  %v4426_v27 = vpop.permute.xlu1 %2484 }
 0x331   : > { %v1782_v41 = vpop.f32.mrf.mxu3 }
 0x332   : > { %v2343_v15 = vmul.f32 %v2326_v55, %v1782_v41 }
 0x333   : > { %v1756_v58 = vpop.f32.mrf.mxu2 }
 0x334   : > { %v2351_v34 = vadd.f32 %v2343_v15, %v4317_v28  ;;  %v1843_v44 = vpop.f32.mrf.mxu1  ;;  %v2344_v35 = vmul.f32 %v2331_v45, %v1756_v58 }
 0x335   : > { %v2393_v3 = vmul.f32 %v2375_v8, %v1843_v44 }
 0x336   : > { %v2352_v13 = vadd.f32 %v2344_v35, %v4321_v16  ;;  %v1817_v4 = vpop.f32.mrf.mxu0  ;;  %v2399_v53 = vadd.f32 %v2391_v59, %v2351_v34  ;;  %v2332_v16 = vsel %vm584_vm3, %v4133_v40, %v4225_v6 }
 0x337   : > { %v2394_v19 = vmul.f32 %v2380_v56, %v1817_v4 }
 0x338   : > { %v2400_v42 = vadd.f32 %v2392_v23, %v2352_v13  ;;  %v4449_v35 = vpop.permute.xlu1 %2440  ;;  %v4454_v23 = vpop.permute.xlu0 %2432 }
 0x339   : > { %v1785_v17 = vpop.f32.mrf.mxu3 }
 0x33a   : > { %v2345_v28 = vmul.f32 %v2327_v32, %v1785_v17  ;;  %v4461_v32 = vpop.permute.xlu2 %2482 }
 0x33b   : > { %v1759_v10 = vpop.f32.mrf.mxu2 }
 0x33c   : > { %v2353_v21 = vadd.f32 %v2345_v28, %v4341_v57  ;;  %v1846_v50 = vpop.f32.mrf.mxu1  ;;  %v2346_v43 = vmul.f32 %v2332_v16, %v1759_v10  ;;  %v2328_v57 = vsel %vm584_vm3, %v4225_v6, %v4133_v40 }
 0x33d   : > { %v2395_v55 = vmul.f32 %v2376_v22, %v1846_v50 }
 0x33e   : > { %v2354_v30 = vadd.f32 %v2346_v43, %v4345_v18  ;;  %v4420_v60 = vpop.f32.mrf.mxu0  ;;  %v2401_v1 = vadd.f32 %v2393_v3, %v2353_v21  ;;  %v2333_v18 = vsel %vm584_vm3, %v4186_v37, %v4267_v38 }
 0x340   : > { %v2402_v61 = vadd.f32 %v2394_v19, %v2354_v30  ;;  %v4466_v8 = vpop.permute.xlu1 %2532 }
 0x341   : > { %v1788_v54 = vpop.f32.mrf.mxu3 }
 0x342   : > { %v2347_v33 = vmul.f32 %v2328_v57, %v1788_v54 }
 0x343   : > { %v1762_v41 = vpop.f32.mrf.mxu2 }
 0x344   : > { %v2355_v15 = vadd.f32 %v2347_v33, %v4367_v52  ;;  %v4437_v48 = vpop.f32.mrf.mxu1  ;;  %v2348_v40 = vmul.f32 %v2333_v18, %v1762_v41 }
 0x346   : > { %v4439_v6 = vadd.f32 %v2348_v40, %v2308_v5  ;;  %v2403_v58 = vadd.f32 %v2395_v55, %v2355_v15  ;;  %v4441_v45 = vpop.f32.mrf.mxu0 }
 0x348   : > { %v4484_v19 = vpop.permute.xlu1 %2438 }
 0x349   : > { %v1791_v59 = vpop.f32.mrf.mxu3 }
 0x34a   : > { %v2349_v34 = vmul.f32 %v2329_v0, %v1791_v59 }
 0x34b   : > { %v1869_v44 = vpop.f32.mrf.mxu2 }
 0x34c   : > { %v2357_v52 = vadd.f32 %v2349_v34, %v2309_v39  ;;  %v2414_v24 = vmul.f32 %v1869_v44, %v3575_v26  ;;  %v4452_v5 = vpop.f32.mrf.mxu1 }
 0x34e   : > { %v4456_v13 = vadd.f32 %v2414_v24, %v2398_v62  ;;  %v4458_v17 = vpop.f32.mrf.mxu0  ;;  %v4472_v62 = vpop.permute.xlu0 %2490 }
 0x351   : > { %v1898_v4 = vpop.f32.mrf.mxu3 }
 0x352   : > { %v2415_v37 = vmul.f32 %v1898_v4, %v3598_v9 }
 0x353   : > { %v1872_v38 = vpop.f32.mrf.mxu2 }
 0x354   : > { %v4463_v28 = vadd.f32 %v2415_v37, %v2399_v53  ;;  %v2416_v39 = vmul.f32 %v1872_v38, %v3626_v25  ;;  %v4470_v10 = vpop.f32.mrf.mxu1  ;;  %v2448_v25 = vsel %vm682_vm7, %v4251_v29, %v4249_v47  ;;  %v2377_v38 = vsel %vm625_vm5, %v4167_v7, %v4277_v2 }
 0x356   : > { %4739 = vst [vmem:[#allocation3_spill] sm:$0xff] %v4463_v28  ;;  %v4468_v26 = vadd.f32 %v2416_v39, %v2400_v42  ;;  %v1933_v21 = vpop.f32.mrf.mxu0  ;;  %v4482_v42 = vpop.permute.xlu2 %2540 }
 0x357   : > { %v2466_v43 = vmul.f32 %v2448_v25, %v1933_v21  ;;  %v4488_v57 = vpop.permute.xlu0 %2430 }
 0x359   : > { %v1901_v16 = vpop.f32.mrf.mxu3 }
 0x35a   : > { %v2417_v3 = vmul.f32 %v1901_v16, %v3661_v20 }
 0x35b   : > { %v1875_v9 = vpop.f32.mrf.mxu2 }
 0x35c   : > { %v4475_v50 = vadd.f32 %v2417_v3, %v2401_v1  ;;  %v2418_v53 = vmul.f32 %v1875_v9, %v3687_v14  ;;  %v1962_v20 = vpop.f32.mrf.mxu1  ;;  %v2397_v3 = vmul.f32 %v2377_v38, %v4437_v48 }
 0x35d   : > { %v2467_v33 = vmul.f32 %v4261_v63, %v1962_v20 }
 0x35e   : > { %v2426_v56 = vadd.f32 %v2418_v53, %v2402_v61  ;;  %v4494_v47 = vpop.permute.xlu2 %2480  ;;  %v4496_v61 = vpop.permute.xlu1 %2530  ;;  %v2405_v53 = vadd.f32 %v2397_v3, %v2357_v52 }
 0x35f   : > { %v4500_v55 = vpop.permute.xlu0 %2488 }
 0x360   : > { %v4486_v30 = vadd.f32 %v2466_v43, %v2426_v56  ;;  %v2453_v56 = vsel %vm682_vm7, %v4237_v51, %v4357_v46 }
 0x361   : > { %v1904_v54 = vpop.f32.mrf.mxu3 }
 0x362   : > { %v2419_v1 = vmul.f32 %v1904_v54, %v3697_v36 }
 0x363   : > { %v1878_v14 = vpop.f32.mrf.mxu2 }
 0x364   : > { %v2427_v22 = vadd.f32 %v2419_v1, %v2403_v58  ;;  %v1936_v58 = vpop.f32.mrf.mxu0  ;;  %v1965_v24 = vpop.f32.mrf.mxu1 }
 0x365   : > { %v2469_v1 = vmul.f32 %v2453_v56, %v1965_v24 }
 0x366   : > { %v4492_v41 = vadd.f32 %v2467_v33, %v2427_v22  ;;  %v4504_v40 = vpop.permute.xlu2 %2538  ;;  %v4508_v59 = vpop.permute.xlu1 %2588 }
 0x367   : > { %v4510_v63 = vpop.permute.xlu0 %2580 }
 0x369   : > { %v1907_v29 = vpop.f32.mrf.mxu3 }
 0x36a   : > { %v2421_v21 = vmul.f32 %v1907_v29, %v3705_v11  ;;  %v2501_v11 = vsel %vm723_vm6, %v4447_v49, %v4426_v27 }
 0x36b   : > { %v4498_v18 = vpop.f32.mrf.mxu2 }
 0x36c   : > { %v4520_v39 = vpop.f32.mrf.mxu0  ;;  %v2429_v43 = vadd.f32 %v2421_v21, %v2405_v53  ;;  %v4530_v20 = vpop.f32.mrf.mxu1 }
 0x36d   : > { %4740 = vst [vmem:[#allocation4_spill] sm:$0xff] %v4530_v20 }
 0x36e   : > { %v2479_v44 = vpop.permute.xlu2 %2478  ;;  %v2529_v4 = vpop.permute.xlu1 %2528  ;;  %v2477_v52 = vadd.f32 %v2469_v1, %v2429_v43  ;;  %v2381_v43 = vsel %vm625_vm5, %v4277_v2, %v4167_v7 }
 0x36f   : > { %v2487_v37 = vpop.permute.xlu0 %2486 }
 0x370   : > { %v2494_v7 = vsel %vm723_vm6, %v2479_v44, %v2487_v37 }
 0x371   : > { %v4502_v15 = vpop.f32.mrf.mxu3 }
 0x373   : > { %v4506_v36 = vpop.f32.mrf.mxu2 }
 0x374   : > { %v4540_v29 = vpop.f32.mrf.mxu0  ;;  %v4548_v53 = vpop.f32.mrf.mxu1 }
 0x375   : > { %4742 = vst [vmem:[#allocation6_spill] sm:$0xff] %v4548_v53 }
 0x376   : > { %v2537_v25 = vpop.permute.xlu2 %2536  ;;  %v4532_v54 = vpop.permute.xlu1 %2586 }
 0x377   : > { %v4538_v48 = vpop.permute.xlu0 %2578 }
 0x379   : > { %v4512_v0 = vpop.f32.mrf.mxu3 }
 0x37b   : > { %v4514_v34 = vpop.f32.mrf.mxu2 }
 0x37c   : > { %v2049_v1 = vpop.f32.mrf.mxu0 }
 0x37e   : > { %v4546_v21 = vpop.permute.xlu2 %2526  ;;  %v4552_v56 = vpop.permute.xlu1 %2576 }
 0x37f   : > { %v4556_v28 = vpop.permute.xlu0 %2534 }
 0x381   : > { %v4522_v16 = vpop.f32.mrf.mxu3 }
 0x383   : > { %v1994_v9 = vpop.f32.mrf.mxu2 }
 0x386   : > { %v4568_v53 = vpop.permute.xlu2 %2584 }
 0x387   : > { %4744 = vst [vmem:[#allocation8_spill] sm:$0xff] %v4568_v53 }
 0x389   : > { %v2023_v33 = vpop.f32.mrf.mxu3 }
 0x38a   : > { %v2517_v22 = vmul.f32 %v2501_v11, %v2023_v33  ;;  %v2623_v33 = vld [vmem:[%s4728_s3] sm:$0xf]  ;;  %v2396_v11 = vmul.f32 %v2381_v43, %v4420_v60  ;;  %v2542_v60 = vsel %vm764_vm9, %v4546_v21, %v4556_v28  ;;  %v4588_v43 = vsel %vm764_vm9, %v2537_v25, %v2529_v4 }
 0x38b   : > { %v4542_v38 = vpop.f32.mrf.mxu2 }
 0x38c   : > { %v4544_v3 = vadd.f32 %v2517_v22, %v2477_v52  ;;  %v2420_v52 = vmul.f32 %v1878_v14, %v3711_v12  ;;  %v2992_v22 = vmov 0   ;;  %v2498_v12 = vsel %vm723_vm6, %v2487_v37, %v2479_v44 }
 0x38d   : > { %2934 = vset.pattern.permute.xlu2 %v2992_v22  ;;  %2935 = vset.pattern.permute.xlu0 %v2992_v22  ;;  %v2543_v14 = vsel %vm764_vm9, %v2529_v4, %v2537_v25  ;;  %v2497_v44 = vsel %vm723_vm6, %v4426_v27, %v4447_v49  ;;  %v2499_v4 = vsel %vm723_vm6, %v4500_v55, %v4494_v47 }
 0x38e   : > { %4741 = vst [vmem:[#allocation5_spill] sm:$0xff] %v4544_v3  ;;  %2626 = vperm.xlu2 %2934, %v2623_v33   ;;  %v4594_v33 = vpop.f32.mrf.mxu1  ;;  %v2516_v25 = vmul.f32 %v2497_v44, %v1994_v9  ;;  %v2446_v27 = vsel %vm682_vm7, %v4488_v57, %v4484_v19  ;;  %v2450_v49 = vsel %vm682_vm7, %v4484_v19, %v4488_v57 }
 0x38f   : > { %v2548_v19 = vsel %vm764_vm9, %v4504_v40, %v4496_v61  ;;  %v2500_v44 = vsel %vm723_vm6, %v4472_v62, %v4461_v32 }
 0x391   : > { %v4550_v24 = vpop.f32.mrf.mxu3 }
 0x392   : > { %4743 = vst [vmem:[#allocation7_spill] sm:$0xff] %v4550_v24  ;;  %v2404_v24 = vadd.f32 %v2396_v11, %v4439_v6  ;;  %v2449_v6 = vsel %vm682_vm7, %v4357_v46, %v4237_v51  ;;  %v4600_v11 = vpop.permute.xlu0 %2574  ;;  %v4602_v51 = vpop.permute.xlu1 %2582 }
 0x393   : > { %v4554_v20 = vpop.f32.mrf.mxu2  ;;  %v2468_v46 = vmul.f32 %v2449_v6, %v1936_v58  ;;  %v2447_v58 = vsel %vm682_vm7, %v4454_v23, %v4449_v35 }
 0x394   : > { %v2428_v3 = vadd.f32 %v2420_v52, %v2404_v24  ;;  %v2495_v24 = vsel %vm723_vm6, %v4494_v47, %v4500_v55  ;;  %v2591_v52 = vsel %vm805_vm10, %v4552_v56, %v4568_v53  ;;  %v2544_v47 = vsel %vm764_vm9, %v4496_v61, %v4504_v40 }
 0x395   : > { %v2496_v55 = vsel %vm723_vm6, %v4461_v32, %v4472_v62  ;;  %v2464_v22 = vmul.f32 %v2447_v58, %v4458_v17  ;;  %v2512_v6 = vmul.f32 %v2495_v24, %v4506_v36  ;;  %v2590_v53 = vsel %vm805_vm10, %v4600_v11, %v4602_v51 }
 0x396   : > { %v2514_v57 = vmul.f32 %v2496_v55, %v4514_v34  ;;  %v2476_v9 = vadd.f32 %v2468_v46, %v2428_v3  ;;  %v2451_v61 = vsel %vm682_vm7, %v4449_v35, %v4454_v23  ;;  %v2545_v17 = vsel %vm764_vm9, %v4466_v8, %v4482_v42  ;;  %v2081_v58 = vpop.f32.mrf.mxu1 }
 0x397   : > { %v2549_v32 = vsel %vm764_vm9, %v4482_v42, %v4466_v8  ;;  %v2462_v40 = vmul.f32 %v2446_v27, %v4441_v45  ;;  %v2510_v36 = vmul.f32 %v2494_v7, %v4498_v18  ;;  %v2472_v34 = vadd.f32 %v2464_v22, %v4468_v26 }
 0x398   : > { %v2524_v62 = vadd.f32 %v2516_v25, %v2476_v9  ;;  %v2592_v35 = vsel %vm805_vm10, %v4538_v48, %v4532_v54  ;;  %v2522_v3 = vadd.f32 %v2514_v57, %v4486_v30  ;;  %v2596_v8 = vsel %vm805_vm10, %v4532_v54, %v4538_v48 }
 0x399   : > { %v4572_v2 = vpop.f32.mrf.mxu3  ;;  %v2593_v45 = vsel %vm805_vm10, %v4510_v63, %v4508_v59  ;;  %v2470_v26 = vadd.f32 %v2462_v40, %v4456_v13  ;;  %v2520_v42 = vadd.f32 %v2512_v6, %v2472_v34  ;;  %v2562_v18 = vmul.f32 %v2544_v47, %v2049_v1  ;;  %v2622_v40 = vld [vmem:[%s4727_s2] sm:$0xf] }
 0x39a   : > { %4745 = vst [vmem:[#allocation9_spill] sm:$0xff] %v4572_v2  ;;  %v2052_v2 = vpop.f32.mrf.mxu0  ;;  %v2597_v30 = vsel %vm805_vm10, %v4508_v59, %v4510_v63  ;;  %v2465_v48 = vmul.f32 %v2451_v61, %v4470_v10  ;;  %v2560_v55 = vmul.f32 %v2543_v14, %v4540_v29  ;;  %v2513_v13 = vmul.f32 %v2499_v4, %v4512_v0  ;;  %v4746_v14 = vld [vmem:[#allocation3_spill] sm:$0xff] }
 0x39b   : > { %v2107_v37 = vpop.f32.mrf.mxu2  ;;  %v2564_v24 = vmul.f32 %v2545_v17, %v2052_v2  ;;  %v2515_v2 = vmul.f32 %v2500_v44, %v4522_v16  ;;  %v2518_v27 = vadd.f32 %v2510_v36, %v2470_v26  ;;  %v2463_v1 = vmul.f32 %v2450_v49, %v4452_v5  ;;  %v4749_v44 = vld [vmem:[#allocation8_spill] sm:$0xff]  ;;  %v4752_v36 = vld [vmem:[#allocation7_spill] sm:$0xff] }
 0x39c   : > { %v2610_v46 = vmul.f32 %v2592_v35, %v2107_v37  ;;  %v2608_v47 = vmul.f32 %v2591_v52, %v4554_v20  ;;  %v2570_v57 = vadd.f32 %v2562_v18, %v2522_v3  ;;  %v2558_v59 = vmul.f32 %v2542_v60, %v4520_v39 }
 0x39d   : > { %v2572_v25 = vadd.f32 %v2564_v24, %v2524_v62  ;;  %v2511_v63 = vmul.f32 %v2498_v12, %v4502_v15  ;;  %v2473_v16 = vadd.f32 %v2465_v48, %v4475_v50  ;;  %v2568_v37 = vadd.f32 %v2560_v55, %v2520_v42  ;;  %v4747_v15 = vld [vmem:[#allocation5_spill] sm:$0xff] }
 0x39e   : > { %v2523_v10 = vadd.f32 %v2515_v2, %v4492_v41  ;;  %v2565_v22 = vmul.f32 %v2549_v32, %v2081_v58  ;;  %v2606_v29 = vmul.f32 %v2590_v53, %v4542_v38  ;;  %v2618_v0 = vadd.f32 %v2610_v46, %v2570_v57  ;;  %v4748_v53 = vld [vmem:[#allocation6_spill] sm:$0xff] }
 0x39f   : > { %v2471_v5 = vadd.f32 %v2463_v1, %v4746_v14  ;;  %v2521_v4 = vadd.f32 %v2513_v13, %v2473_v16  ;;  %v2563_v20 = vmul.f32 %v2548_v19, %v4594_v33  ;;  %v2566_v52 = vadd.f32 %v2558_v59, %v2518_v27 }
 0x3a0   : > { %v2616_v39 = vadd.f32 %v2608_v47, %v2568_v37  ;;  %v2573_v12 = vadd.f32 %v2565_v22, %v4747_v15  ;;  %v2546_v41 = vsel %vm764_vm9, %v4556_v28, %v4546_v21  ;;  %v2561_v6 = vmul.f32 %v4588_v43, %v4748_v53  ;;  %v4751_v28 = vld [vmem:[#allocation4_spill] sm:$0xff] }
 0x3a1   : > { %v2136_v23 = vpop.f32.mrf.mxu3  ;;  %v2519_v38 = vadd.f32 %v2511_v63, %v2471_v5  ;;  %v2595_v33 = vsel %vm805_vm10, %v4749_v44, %v4552_v56  ;;  %v2614_v19 = vadd.f32 %v2606_v29, %v2566_v52  ;;  %v4750_v61 = vld [vmem:[#allocation9_spill] sm:$0xff]  ;;  %v2571_v32 = vadd.f32 %v2563_v20, %v2523_v10 }
 0x3a2   : > { %v2611_v60 = vmul.f32 %v2596_v8, %v2136_v23  ;;  %v2609_v17 = vmul.f32 %v2595_v33, %v4750_v61  ;;  %v2559_v21 = vmul.f32 %v2546_v41, %v4751_v28  ;;  %v2594_v43 = vsel %vm805_vm10, %v4602_v51, %v4600_v11 }
 0x3a3   : > { %v2110_v7 = vpop.f32.mrf.mxu2  ;;  %v2607_v34 = vmul.f32 %v2594_v43, %v4752_v36  ;;  %v2569_v56 = vadd.f32 %v2561_v6, %v2521_v4 }
 0x3a4   : > { %v2612_v54 = vmul.f32 %v2593_v45, %v2110_v7  ;;  %v2619_v35 = vadd.f32 %v2611_v60, %v2571_v32  ;;  %v2567_v23 = vadd.f32 %v2559_v21, %v2519_v38 }
 0x3a5   : > { %v2617_v3 = vadd.f32 %v2609_v17, %v2569_v56 }
 0x3a6   : > { %v2620_v9 = vadd.f32 %v2612_v54, %v2572_v25  ;;  %v2615_v24 = vadd.f32 %v2607_v34, %v2567_v23 }
 0x3a8   : > { %2644 = vmatpush.msrb.mxu0 %v2620_v9 }
 0x3a9   : > { %v2139_v49 = vpop.f32.mrf.mxu3 }
 0x3aa   : > { %v2613_v50 = vmul.f32 %v2597_v30, %v2139_v49  ;;  %2645 = vmatpush.msrb.mxu0 %v2618_v0 }
 0x3ac   : > { %v2621_v62 = vadd.f32 %v2613_v50, %v2573_v12  ;;  %2646 = vmatpush.msrb.mxu0 %v2616_v39 }
 0x3ae   : > { %2664 = vmatpush.msrb.mxu1 %v2621_v62  ;;  %2647 = vmatpush.msrb.mxu0 %v2614_v19 }
 0x3af   : > { %2910 = vmatmul.msk.f32.vlgmr.msrb.gmra.mxu0 %vm903_vm8, %v2622_v40 }
 0x3b0   : > { %2665 = vmatpush.msrb.mxu1 %v2619_v35 }
 0x3b2   : > { %2666 = vmatpush.msrb.mxu1 %v2617_v3 }
 0x3b4   : > { %2667 = vmatpush.msrb.mxu1 %v2615_v24 }
 0x3b5   : > { %2911 = vmatmul.msk.f32.vlgmr.msrb.gmra.mxu1 %vm903_vm8, %v2622_v40 }
 0x3e8   : > { %v2627_v8 = vpop.permute.xlu2 %2626 }
 0x42c   : > { %v2649_v11 = vpop.f32.mrf.mxu0 }
 0x42d   : > { %v2650_v26 = vadd.f32 %v2649_v11, %v2627_v8 }
 0x432   : > { %v2669_v31 = vpop.f32.mrf.mxu1 }
 0x433   : > { %v2670_v51 = vadd.f32 %v2669_v31, %v2627_v8 }
 0x435   : > { %v2674_v45 = vrot.slane %v2670_v51, 4 }
 0x437   : > { %v2675_v42 = vsel %vm373_vm0, %v2650_v26, %v2674_v45 }
 0x438   : > { %2677 = vst [vmem:[%s313_s14] sm:$0xff] %v2675_v42 }
 0x439 PF: > { %s19_s27 = sadd.s32 1, %s2982_s27  }
 0x43a   : > { %p16_p4 = scmp.ge.s32.totalorder %s19_s27, 4  }
 0x43c   :  { %18 = sbr.rel (!%p16_p4) target bundleno = 1 (0x1), region = 90 }

</bundles_post_ra>
